<compile_context>
chip_gen: v7x
topology: tpu7x:2x2x1
jax: 0.10.0
libtpu: 0.0.40
codegen_flags: <defaults>
</compile_context>

<pallas_src>
import math
import functools

import jax
import jax.numpy as jnp
from jax.experimental import pallas as pl
from jax.experimental.pallas import tpu as pltpu


# ----------------------------- kernel ------------------------------------- #

def _layer_norm(z, gamma, beta, eps=1e-3):
    # fastNLP LayerNormalization: unbiased std (N-1), eps added to sigma.
    # Exact division here (review: keep approx reciprocal only for softmax).
    n = z.shape[-1]
    mu = jnp.mean(z, axis=-1, keepdims=True)
    var = jnp.sum((z - mu) ** 2, axis=-1, keepdims=True) * (1.0 / (n - 1))
    sigma = jnp.sqrt(var)
    return (z - mu) / (sigma + eps) * gamma + beta


def sublayer_kernel(x_ref,
                    wq_ref, bq_ref, wk_ref, bk_ref, wv_ref, bv_ref,
                    wo_ref, bo_ref,
                    g1_ref, be1_ref,
                    w1_ref, b1_ref, w2_ref, b2_ref,
                    g2_ref, be2_ref,
                    o_ref,
                    *, num_heads, key_size, value_size):
    H, dk, vd = num_heads, key_size, value_size
    S, D = x_ref.shape
    inv_scale = 1.0 / math.sqrt(dk)

    x = x_ref[...]                                       # [S, D] f32
    xb = x.astype(jnp.bfloat16)
    # heads batched in the leading dim; stays register-resident (tiny toy sizes)
    x3 = jnp.broadcast_to(xb[None, :, :], (H, S, D))     # [H, S, D] bf16

    # ---- head-batched Q/K/V projections (leading-batch, contract-last einsums)
    q = jnp.einsum('hsd,hkd->hsk', x3, wq_ref[...],
                   preferred_element_type=jnp.float32) + bq_ref[...]   # [H,S,dk]
    k = jnp.einsum('hsd,hkd->hsk', x3, wk_ref[...],
                   preferred_element_type=jnp.float32) + bk_ref[...]   # [H,S,dk]
    v = jnp.einsum('hsd,hkd->hsk', x3, wv_ref[...],
                   preferred_element_type=jnp.float32) + bv_ref[...]   # [H,S,vd]

    # ---- scaled dot-product attention, all heads in one batched einsum -------
    s = jnp.einsum('hqd,hkd->hqk', q.astype(jnp.bfloat16), k.astype(jnp.bfloat16),
                   preferred_element_type=jnp.float32) * inv_scale      # [H,S,S]
    s = s - jnp.max(s, axis=-1, keepdims=True)           # softmax stays f32
    p = jnp.exp(s)
    p = p * pl.reciprocal(jnp.sum(p, axis=-1, keepdims=True), approx=True)  # EUP
    ctx = jnp.einsum('hqk,hkv->hqv', p.astype(jnp.bfloat16), v.astype(jnp.bfloat16),
                     preferred_element_type=jnp.float32)                 # [H,S,vd]

    # ---- head-concat fused into the output projection ------------------------
    # concat(heads) @ Wo  ==  sum_h  ctx_h @ Wo_h ; done as one batched einsum
    # followed by H full-block VALU adds (no lane slicing, no VMEM scratch).
    att_h = jnp.einsum('hqv,hdv->hqd', ctx.astype(jnp.bfloat16), wo_ref[...],
                       preferred_element_type=jnp.float32)               # [H,S,D]
    att = att_h[0]
    for h in range(1, H):                                # static, relayout-free adds
        att = att + att_h[h]
    att = att + bo_ref[...]                              # [S, D]

    norm_atte = _layer_norm(att + x, g1_ref[...], be1_ref[...])

    # ---- position-wise FFN ----------------------------------------------------
    hdn = jnp.dot(norm_atte.astype(jnp.bfloat16), w1_ref[...],
                  preferred_element_type=jnp.float32) + b1_ref[...]
    hdn = jnp.maximum(hdn, 0.0)                          # ReLU
    ffn = jnp.dot(hdn.astype(jnp.bfloat16), w2_ref[...],
                  preferred_element_type=jnp.float32) + b2_ref[...]

    o_ref[...] = _layer_norm(ffn + norm_atte, g2_ref[...], be2_ref[...])


# ----------------------------- wrapper ------------------------------------ #

def _pack_params(p):
    """Repack weights wrapper-side into head-batched, contraction-last layouts
    (bf16 matmul weights, f32 biases / layernorm params)."""
    H, D, dk = p["wq"].shape
    vd = p["wv"].shape[2]
    return dict(
        wq=jnp.transpose(p["wq"], (0, 2, 1)).astype(jnp.bfloat16),   # [H, dk, D]
        bq=p["bq"],                                                  # [H, 1, dk]
        wk=jnp.transpose(p["wk"], (0, 2, 1)).astype(jnp.bfloat16),   # [H, dk, D]
        bk=p["bk"],
        wv=jnp.transpose(p["wv"], (0, 2, 1)).astype(jnp.bfloat16),   # [H, vd, D]
        bv=p["bv"],
        # wo is [H*vd, D] head-major -> per-head [H, D, vd] (contract over vd)
        wo=jnp.transpose(p["wo"].reshape(H, vd, p["wo"].shape[1]),
                         (0, 2, 1)).astype(jnp.bfloat16),            # [H, D, vd]
        bo=p["bo"],
        g1=p["g1"], be1=p["be1"],
        w1=p["w1"].astype(jnp.bfloat16), b1=p["b1"],
        w2=p["w2"].astype(jnp.bfloat16), b2=p["b2"],
        g2=p["g2"], be2=p["be2"],
    )


def sublayer_forward(x, params, *, num_heads, key_size, value_size):
    """One TransformerEncoder.SubLayer forward.  Grid over the batch dimension
    (attention needs the whole sequence per batch element); weights are
    full-shape resident blocks fetched once."""
    B, S, D = x.shape
    packed = _pack_params(params)
    order = ["wq", "bq", "wk", "bk", "wv", "bv", "wo", "bo",
             "g1", "be1", "w1", "b1", "w2", "b2", "g2", "be2"]
    weights = [packed[k] for k in order]

    def resident(arr):
        rank = arr.ndim
        return pl.BlockSpec(arr.shape, lambda b, _r=rank: (0,) * _r)

    kernel = functools.partial(sublayer_kernel, num_heads=num_heads,
                               key_size=key_size, value_size=value_size)

    return pl.pallas_call(
        kernel,
        out_shape=jax.ShapeDtypeStruct((B, S, D), jnp.float32),
        grid=(B,),
        in_specs=[pl.BlockSpec((None, S, D), lambda b: (b, 0, 0))]
                 + [resident(w) for w in weights],
        out_specs=pl.BlockSpec((None, S, D), lambda b: (b, 0, 0)),
        compiler_params=pltpu.CompilerParams(
            dimension_semantics=("parallel",),          # v7x: both TensorCores
            vmem_limit_bytes=32 * 1024 * 1024),         # explicit, v7x-safe budget
    )(x, *weights)


def transformer_encoder_forward(x, layers_params, *, num_heads, key_size,
                                value_size):
    # Faithful to the PyTorch code: layers are NOT chained -- every layer
    # consumes the original x and only the LAST result is returned, so only
    # the last layer needs to execute.
    params = layers_params[-1]
    return sublayer_forward(x, params, num_heads=num_heads,
                            key_size=key_size, value_size=value_size)


# ------------------------ reference & params ------------------------------- #

def sublayer_reference(x, p):
    """Pure-JAX f32 reference of one SubLayer forward (matches the module)."""
    H, D, dk = p["wq"].shape
    vd = p["wv"].shape[2]
    B, S, _ = x.shape
    q = jnp.einsum('bsd,hdk->bhsk', x, p["wq"]) + p["bq"][None]
    k = jnp.einsum('bsd,hdk->bhsk', x, p["wk"]) + p["bk"][None]
    v = jnp.einsum('bsd,hdk->bhsk', x, p["wv"]) + p["bv"][None]
    s = jnp.einsum('bhqd,bhkd->bhqk', q, k) / math.sqrt(dk)
    a = jax.nn.softmax(s, axis=-1)
    ctx = jnp.einsum('bhqk,bhkv->bhqv', a, v)                      # [B,H,S,vd]
    concat = jnp.transpose(ctx, (0, 2, 1, 3)).reshape(B, S, H * vd)
    att = concat @ p["wo"] + p["bo"]

    def ln(z, g, b, eps=1e-3):
        mu = jnp.mean(z, -1, keepdims=True)
        sig = jnp.sqrt(jnp.sum((z - mu) ** 2, -1, keepdims=True) / (z.shape[-1] - 1))
        return (z - mu) / (sig + eps) * g + b

    n1 = ln(att + x, p["g1"], p["be1"])
    h = jnp.maximum(n1 @ p["w1"] + p["b1"], 0.0)
    f = h @ p["w2"] + p["b2"]
    return ln(f + n1, p["g2"], p["be2"])


def make_sublayer_params(key, input_size, output_size, key_size, value_size,
                         num_atte):
    """Deterministic synthetic parameters (shapes from the module __init__)."""
    ks = jax.random.split(key, 12)
    s = 0.05
    return {
        # per-head Q/K/V projections stored as [H, in, out]; biases [H, 1, out]
        "wq": s * jax.random.normal(ks[0], (num_atte, input_size, key_size), jnp.float32),
        "bq": s * jax.random.normal(ks[1], (num_atte, 1, key_size), jnp.float32),
        "wk": s * jax.random.normal(ks[2], (num_atte, input_size, key_size), jnp.float32),
        "bk": s * jax.random.normal(ks[3], (num_atte, 1, key_size), jnp.float32),
        "wv": s * jax.random.normal(ks[4], (num_atte, input_size, value_size), jnp.float32),
        "bv": s * jax.random.normal(ks[5], (num_atte, 1, value_size), jnp.float32),
        # output projection of the concatenated heads
        "wo": s * jax.random.normal(ks[6], (num_atte * value_size, output_size), jnp.float32),
        "bo": s * jax.random.normal(ks[7], (1, output_size), jnp.float32),
        # LayerNormalization 1 (a_2 ones, b_2 zeros as in the module)
        "g1": jnp.ones((1, output_size), jnp.float32),
        "be1": jnp.zeros((1, output_size), jnp.float32),
        # FFN: Linear(output,output) -> ReLU -> Linear(output,output)
        "w1": s * jax.random.normal(ks[8], (output_size, output_size), jnp.float32),
        "b1": s * jax.random.normal(ks[9], (1, output_size), jnp.float32),
        "w2": s * jax.random.normal(ks[10], (output_size, output_size), jnp.float32),
        "b2": s * jax.random.normal(ks[11], (1, output_size), jnp.float32),
        # LayerNormalization 2
        "g2": jnp.ones((1, output_size), jnp.float32),
        "be2": jnp.zeros((1, output_size), jnp.float32),
    }


# ------------------------------ main --------------------------------------- #

if __name__ == "__main__":
    # small shapes: batch=2, seq=8, hidden(input_size=output_size)=32,
    # key_size=value_size=16, num_atte=4 heads, num_layers=2
    B, S = 2, 8
    input_size = output_size = 32
    key_size = value_size = 16
    num_atte = 4
    num_layers = 2

    root = jax.random.PRNGKey(0)
    kx, kp = jax.random.split(root)
    x = jax.random.normal(kx, (B, S, input_size), jnp.float32)

    layer_keys = jax.random.split(kp, num_layers)
    layers_params = [
        make_sublayer_params(layer_keys[i], input_size, output_size,
                             key_size, value_size, num_atte)
        for i in range(num_layers)
    ]

    y = transformer_encoder_forward(x, layers_params,
                                    num_heads=num_atte, key_size=key_size,
                                    value_size=value_size)
    y = jax.block_until_ready(y)

    # tolerance check vs pure-JAX f32 reference (bf16 MXU + approx softmax recip)
    y_ref = sublayer_reference(x, layers_params[-1])
    err = float(jnp.max(jnp.abs(y - y_ref)))
    assert y.shape == (B, S, output_size)
    assert jnp.all(jnp.isfinite(y))
    assert err < 5e-2, f"max abs error vs reference too large: {err}"
    print("KERNEL_OK")
</pallas_src>

<mosaic_0001>
module attributes {stable_mosaic.version = 11 : i64} {
  func.func @sublayer_kernel(%arg0: i32, %arg1: memref<1x8x32xf32, #tpu.memory_space<vmem>>, %arg2: memref<4x16x32xbf16, #tpu.memory_space<vmem>>, %arg3: memref<4x1x16xf32, #tpu.memory_space<vmem>>, %arg4: memref<4x16x32xbf16, #tpu.memory_space<vmem>>, %arg5: memref<4x1x16xf32, #tpu.memory_space<vmem>>, %arg6: memref<4x16x32xbf16, #tpu.memory_space<vmem>>, %arg7: memref<4x1x16xf32, #tpu.memory_space<vmem>>, %arg8: memref<4x32x16xbf16, #tpu.memory_space<vmem>>, %arg9: memref<1x32xf32, #tpu.memory_space<vmem>>, %arg10: memref<1x32xf32, #tpu.memory_space<vmem>>, %arg11: memref<1x32xf32, #tpu.memory_space<vmem>>, %arg12: memref<32x32xbf16, #tpu.memory_space<vmem>>, %arg13: memref<1x32xf32, #tpu.memory_space<vmem>>, %arg14: memref<32x32xbf16, #tpu.memory_space<vmem>>, %arg15: memref<1x32xf32, #tpu.memory_space<vmem>>, %arg16: memref<1x32xf32, #tpu.memory_space<vmem>>, %arg17: memref<1x32xf32, #tpu.memory_space<vmem>>, %arg18: memref<1x8x32xf32, #tpu.memory_space<vmem>>) attributes {dimension_semantics = [#tpu.dimension_semantics<parallel>], iteration_bounds = array<i64: 2>, scalar_prefetch = 0 : i64, scratch_operands = 0 : i64, tpu.core_type = #tpu.core_type<tc>, window_params = [{transform_indices = @transform_0, window_bounds = array<i64: 1, 8, 32>}, {pipeline_mode = #tpu.pipeline_mode<synchronous>, transform_indices = @transform_1, window_bounds = array<i64: 4, 16, 32>}, {pipeline_mode = #tpu.pipeline_mode<synchronous>, transform_indices = @transform_2, window_bounds = array<i64: 4, 1, 16>}, {pipeline_mode = #tpu.pipeline_mode<synchronous>, transform_indices = @transform_3, window_bounds = array<i64: 4, 16, 32>}, {pipeline_mode = #tpu.pipeline_mode<synchronous>, transform_indices = @transform_4, window_bounds = array<i64: 4, 1, 16>}, {pipeline_mode = #tpu.pipeline_mode<synchronous>, transform_indices = @transform_5, window_bounds = array<i64: 4, 16, 32>}, {pipeline_mode = #tpu.pipeline_mode<synchronous>, transform_indices = @transform_6, window_bounds = array<i64: 4, 1, 16>}, {pipeline_mode = #tpu.pipeline_mode<synchronous>, transform_indices = @transform_7, window_bounds = array<i64: 4, 32, 16>}, {pipeline_mode = #tpu.pipeline_mode<synchronous>, transform_indices = @transform_8, window_bounds = array<i64: 1, 32>}, {pipeline_mode = #tpu.pipeline_mode<synchronous>, transform_indices = @transform_9, window_bounds = array<i64: 1, 32>}, {pipeline_mode = #tpu.pipeline_mode<synchronous>, transform_indices = @transform_10, window_bounds = array<i64: 1, 32>}, {pipeline_mode = #tpu.pipeline_mode<synchronous>, transform_indices = @transform_11, window_bounds = array<i64: 32, 32>}, {pipeline_mode = #tpu.pipeline_mode<synchronous>, transform_indices = @transform_12, window_bounds = array<i64: 1, 32>}, {pipeline_mode = #tpu.pipeline_mode<synchronous>, transform_indices = @transform_13, window_bounds = array<i64: 32, 32>}, {pipeline_mode = #tpu.pipeline_mode<synchronous>, transform_indices = @transform_14, window_bounds = array<i64: 1, 32>}, {pipeline_mode = #tpu.pipeline_mode<synchronous>, transform_indices = @transform_15, window_bounds = array<i64: 1, 32>}, {pipeline_mode = #tpu.pipeline_mode<synchronous>, transform_indices = @transform_16, window_bounds = array<i64: 1, 32>}, {transform_indices = @transform_17, window_bounds = array<i64: 1, 8, 32>}]} {
    %c0 = arith.constant 0 : index
    %c0_0 = arith.constant 0 : index
    %c0_1 = arith.constant 0 : index
    %0 = vector.load %arg1[%c0, %c0_0, %c0_1] : memref<1x8x32xf32, #tpu.memory_space<vmem>>, vector<1x8x32xf32>
    %1 = vector.shape_cast %0 : vector<1x8x32xf32> to vector<8x32xf32>
    %2 = arith.truncf %1 : vector<8x32xf32> to vector<8x32xbf16>
    %3 = vector.shape_cast %2 : vector<8x32xbf16> to vector<1x8x32xbf16>
    %4 = vector.shape_cast %3 : vector<1x8x32xbf16> to vector<1x8x32xbf16>
    %5 = vector.broadcast %4 : vector<1x8x32xbf16> to vector<4x8x32xbf16>
    %c0_2 = arith.constant 0 : index
    %c0_3 = arith.constant 0 : index
    %c0_4 = arith.constant 0 : index
    %6 = vector.load %arg2[%c0_2, %c0_3, %c0_4] : memref<4x16x32xbf16, #tpu.memory_space<vmem>>, vector<4x16x32xbf16>
    "tpu.trace_start"() <{level = 10 : i32, message = "hsd,hkd->hsk"}> : () -> ()
    %cst = arith.constant dense<0.000000e+00> : vector<4x8x16xf32>
    %7 = tpu.matmul %5, %6, %cst {dimension_numbers = #tpu.dot_dimension_numbers<[2], [2], [1], [1], [0, 0, 0, 1, 1, 1], [0], [0]>} : vector<4x8x32xbf16>, vector<4x16x32xbf16>, vector<4x8x16xf32> -> vector<4x8x16xf32>
    "tpu.trace_stop"() : () -> ()
    %c0_5 = arith.constant 0 : index
    %c0_6 = arith.constant 0 : index
    %c0_7 = arith.constant 0 : index
    %8 = vector.load %arg3[%c0_5, %c0_6, %c0_7] : memref<4x1x16xf32, #tpu.memory_space<vmem>>, vector<4x1x16xf32>
    %9 = vector.broadcast %8 : vector<4x1x16xf32> to vector<4x8x16xf32>
    %10 = arith.addf %7, %9 : vector<4x8x16xf32>
    %c0_8 = arith.constant 0 : index
    %c0_9 = arith.constant 0 : index
    %c0_10 = arith.constant 0 : index
    %11 = vector.load %arg4[%c0_8, %c0_9, %c0_10] : memref<4x16x32xbf16, #tpu.memory_space<vmem>>, vector<4x16x32xbf16>
    "tpu.trace_start"() <{level = 10 : i32, message = "hsd,hkd->hsk"}> : () -> ()
    %cst_11 = arith.constant dense<0.000000e+00> : vector<4x8x16xf32>
    %12 = tpu.matmul %5, %11, %cst_11 {dimension_numbers = #tpu.dot_dimension_numbers<[2], [2], [1], [1], [0, 0, 0, 1, 1, 1], [0], [0]>} : vector<4x8x32xbf16>, vector<4x16x32xbf16>, vector<4x8x16xf32> -> vector<4x8x16xf32>
    "tpu.trace_stop"() : () -> ()
    %c0_12 = arith.constant 0 : index
    %c0_13 = arith.constant 0 : index
    %c0_14 = arith.constant 0 : index
    %13 = vector.load %arg5[%c0_12, %c0_13, %c0_14] : memref<4x1x16xf32, #tpu.memory_space<vmem>>, vector<4x1x16xf32>
    %14 = vector.broadcast %13 : vector<4x1x16xf32> to vector<4x8x16xf32>
    %15 = arith.addf %12, %14 : vector<4x8x16xf32>
    %c0_15 = arith.constant 0 : index
    %c0_16 = arith.constant 0 : index
    %c0_17 = arith.constant 0 : index
    %16 = vector.load %arg6[%c0_15, %c0_16, %c0_17] : memref<4x16x32xbf16, #tpu.memory_space<vmem>>, vector<4x16x32xbf16>
    "tpu.trace_start"() <{level = 10 : i32, message = "hsd,hkd->hsk"}> : () -> ()
    %cst_18 = arith.constant dense<0.000000e+00> : vector<4x8x16xf32>
    %17 = tpu.matmul %5, %16, %cst_18 {dimension_numbers = #tpu.dot_dimension_numbers<[2], [2], [1], [1], [0, 0, 0, 1, 1, 1], [0], [0]>} : vector<4x8x32xbf16>, vector<4x16x32xbf16>, vector<4x8x16xf32> -> vector<4x8x16xf32>
    "tpu.trace_stop"() : () -> ()
    %c0_19 = arith.constant 0 : index
    %c0_20 = arith.constant 0 : index
    %c0_21 = arith.constant 0 : index
    %18 = vector.load %arg7[%c0_19, %c0_20, %c0_21] : memref<4x1x16xf32, #tpu.memory_space<vmem>>, vector<4x1x16xf32>
    %19 = vector.broadcast %18 : vector<4x1x16xf32> to vector<4x8x16xf32>
    %20 = arith.addf %17, %19 : vector<4x8x16xf32>
    %21 = arith.truncf %10 : vector<4x8x16xf32> to vector<4x8x16xbf16>
    %22 = arith.truncf %15 : vector<4x8x16xf32> to vector<4x8x16xbf16>
    "tpu.trace_start"() <{level = 10 : i32, message = "hqd,hkd->hqk"}> : () -> ()
    %cst_22 = arith.constant dense<0.000000e+00> : vector<4x8x8xf32>
    %23 = tpu.matmul %21, %22, %cst_22 {dimension_numbers = #tpu.dot_dimension_numbers<[2], [2], [1], [1], [0, 0, 0, 1, 1, 1], [0], [0]>} : vector<4x8x16xbf16>, vector<4x8x16xbf16>, vector<4x8x8xf32> -> vector<4x8x8xf32>
    "tpu.trace_stop"() : () -> ()
    %cst_23 = arith.constant 2.500000e-01 : f32
    %24 = vector.broadcast %cst_23 : f32 to vector<4x8x8xf32>
    %25 = arith.mulf %23, %24 : vector<4x8x8xf32>
    %cst_24 = arith.constant dense<0xFF800000> : vector<4x8xf32>
    %26 = vector.multi_reduction <maximumf>, %25, %cst_24 [2] : vector<4x8x8xf32> to vector<4x8xf32>
    %27 = vector.shape_cast %26 : vector<4x8xf32> to vector<4x8x1xf32>
    %28 = vector.broadcast %27 : vector<4x8x1xf32> to vector<4x8x8xf32>
    %29 = arith.subf %25, %28 : vector<4x8x8xf32>
    %30 = math.exp %29 : vector<4x8x8xf32>
    %cst_25 = arith.constant dense<0.000000e+00> : vector<4x8xf32>
    %31 = vector.multi_reduction <add>, %30, %cst_25 [2] : vector<4x8x8xf32> to vector<4x8xf32>
    %32 = vector.shape_cast %31 : vector<4x8xf32> to vector<4x8x1xf32>
    %33 = tpu.reciprocal %32 {approx = true} : vector<4x8x1xf32> -> vector<4x8x1xf32>
    %34 = vector.broadcast %33 : vector<4x8x1xf32> to vector<4x8x8xf32>
    %35 = arith.mulf %30, %34 : vector<4x8x8xf32>
    %36 = arith.truncf %35 : vector<4x8x8xf32> to vector<4x8x8xbf16>
    %37 = arith.truncf %20 : vector<4x8x16xf32> to vector<4x8x16xbf16>
    "tpu.trace_start"() <{level = 10 : i32, message = "hqk,hkv->hqv"}> : () -> ()
    %cst_26 = arith.constant dense<0.000000e+00> : vector<4x8x16xf32>
    %38 = tpu.matmul %36, %37, %cst_26 {dimension_numbers = #tpu.dot_dimension_numbers<[2], [1], [1], [2], [0, 0, 0, 1, 1, 2], [0], [0]>} : vector<4x8x8xbf16>, vector<4x8x16xbf16>, vector<4x8x16xf32> -> vector<4x8x16xf32>
    "tpu.trace_stop"() : () -> ()
    %39 = arith.truncf %38 : vector<4x8x16xf32> to vector<4x8x16xbf16>
    %c0_27 = arith.constant 0 : index
    %c0_28 = arith.constant 0 : index
    %c0_29 = arith.constant 0 : index
    %40 = vector.load %arg8[%c0_27, %c0_28, %c0_29] : memref<4x32x16xbf16, #tpu.memory_space<vmem>>, vector<4x32x16xbf16>
    "tpu.trace_start"() <{level = 10 : i32, message = "hqv,hdv->hqd"}> : () -> ()
    %cst_30 = arith.constant dense<0.000000e+00> : vector<4x8x32xf32>
    %41 = tpu.matmul %39, %40, %cst_30 {dimension_numbers = #tpu.dot_dimension_numbers<[2], [2], [1], [1], [0, 0, 0, 1, 1, 1], [0], [0]>} : vector<4x8x16xbf16>, vector<4x32x16xbf16>, vector<4x8x32xf32> -> vector<4x8x32xf32>
    "tpu.trace_stop"() : () -> ()
    %42 = vector.extract_strided_slice %41 {offsets = [0, 0, 0], sizes = [1, 8, 32], strides = [1, 1, 1]} : vector<4x8x32xf32> to vector<1x8x32xf32>
    %43 = vector.shape_cast %42 : vector<1x8x32xf32> to vector<8x32xf32>
    %44 = vector.extract_strided_slice %41 {offsets = [1, 0, 0], sizes = [1, 8, 32], strides = [1, 1, 1]} : vector<4x8x32xf32> to vector<1x8x32xf32>
    %45 = vector.shape_cast %44 : vector<1x8x32xf32> to vector<8x32xf32>
    %46 = arith.addf %43, %45 : vector<8x32xf32>
    %47 = vector.extract_strided_slice %41 {offsets = [2, 0, 0], sizes = [1, 8, 32], strides = [1, 1, 1]} : vector<4x8x32xf32> to vector<1x8x32xf32>
    %48 = vector.shape_cast %47 : vector<1x8x32xf32> to vector<8x32xf32>
    %49 = arith.addf %46, %48 : vector<8x32xf32>
    %50 = vector.extract_strided_slice %41 {offsets = [3, 0, 0], sizes = [1, 8, 32], strides = [1, 1, 1]} : vector<4x8x32xf32> to vector<1x8x32xf32>
    %51 = vector.shape_cast %50 : vector<1x8x32xf32> to vector<8x32xf32>
    %52 = arith.addf %49, %51 : vector<8x32xf32>
    %c0_31 = arith.constant 0 : index
    %c0_32 = arith.constant 0 : index
    %53 = vector.load %arg9[%c0_31, %c0_32] : memref<1x32xf32, #tpu.memory_space<vmem>>, vector<1x32xf32>
    %54 = vector.broadcast %53 : vector<1x32xf32> to vector<8x32xf32>
    %55 = arith.addf %52, %54 : vector<8x32xf32>
    %56 = arith.addf %55, %1 : vector<8x32xf32>
    %c0_33 = arith.constant 0 : index
    %c0_34 = arith.constant 0 : index
    %57 = vector.load %arg10[%c0_33, %c0_34] : memref<1x32xf32, #tpu.memory_space<vmem>>, vector<1x32xf32>
    %c0_35 = arith.constant 0 : index
    %c0_36 = arith.constant 0 : index
    %58 = vector.load %arg11[%c0_35, %c0_36] : memref<1x32xf32, #tpu.memory_space<vmem>>, vector<1x32xf32>
    %cst_37 = arith.constant dense<0.000000e+00> : vector<8xf32>
    %59 = vector.multi_reduction <add>, %56, %cst_37 [1] : vector<8x32xf32> to vector<8xf32>
    %60 = vector.shape_cast %59 : vector<8xf32> to vector<8x1xf32>
    %cst_38 = arith.constant 3.200000e+01 : f32
    %61 = vector.broadcast %cst_38 : f32 to vector<8x1xf32>
    %62 = arith.divf %60, %61 : vector<8x1xf32>
    %63 = vector.broadcast %62 : vector<8x1xf32> to vector<8x32xf32>
    %64 = arith.subf %56, %63 : vector<8x32xf32>
    %65 = arith.mulf %64, %64 : vector<8x32xf32>
    %cst_39 = arith.constant dense<0.000000e+00> : vector<8xf32>
    %66 = vector.multi_reduction <add>, %65, %cst_39 [1] : vector<8x32xf32> to vector<8xf32>
    %67 = vector.shape_cast %66 : vector<8xf32> to vector<8x1xf32>
    %cst_40 = arith.constant 0.0322580636 : f32
    %68 = vector.broadcast %cst_40 : f32 to vector<8x1xf32>
    %69 = arith.mulf %67, %68 : vector<8x1xf32>
    %70 = math.sqrt %69 : vector<8x1xf32>
    %71 = vector.broadcast %62 : vector<8x1xf32> to vector<8x32xf32>
    %72 = arith.subf %56, %71 : vector<8x32xf32>
    %cst_41 = arith.constant 1.000000e-03 : f32
    %73 = vector.broadcast %cst_41 : f32 to vector<8x1xf32>
    %74 = arith.addf %70, %73 : vector<8x1xf32>
    %75 = vector.broadcast %74 : vector<8x1xf32> to vector<8x32xf32>
    %76 = arith.divf %72, %75 : vector<8x32xf32>
    %77 = vector.broadcast %57 : vector<1x32xf32> to vector<8x32xf32>
    %78 = arith.mulf %76, %77 : vector<8x32xf32>
    %79 = vector.broadcast %58 : vector<1x32xf32> to vector<8x32xf32>
    %80 = arith.addf %78, %79 : vector<8x32xf32>
    %81 = arith.truncf %80 : vector<8x32xf32> to vector<8x32xbf16>
    %c0_42 = arith.constant 0 : index
    %c0_43 = arith.constant 0 : index
    %82 = vector.load %arg12[%c0_42, %c0_43] : memref<32x32xbf16, #tpu.memory_space<vmem>>, vector<32x32xbf16>
    %cst_44 = arith.constant dense<0.000000e+00> : vector<8x32xf32>
    %83 = tpu.matmul %81, %82, %cst_44 {dimension_numbers = #tpu.dot_dimension_numbers<[1], [0], [0], [1], [0, 0, 1, 1], [], []>} : vector<8x32xbf16>, vector<32x32xbf16>, vector<8x32xf32> -> vector<8x32xf32>
    %c0_45 = arith.constant 0 : index
    %c0_46 = arith.constant 0 : index
    %84 = vector.load %arg13[%c0_45, %c0_46] : memref<1x32xf32, #tpu.memory_space<vmem>>, vector<1x32xf32>
    %85 = vector.broadcast %84 : vector<1x32xf32> to vector<8x32xf32>
    %86 = arith.addf %83, %85 : vector<8x32xf32>
    %cst_47 = arith.constant 0.000000e+00 : f32
    %87 = vector.broadcast %cst_47 : f32 to vector<8x32xf32>
    %88 = arith.maximumf %86, %87 : vector<8x32xf32>
    %89 = arith.truncf %88 : vector<8x32xf32> to vector<8x32xbf16>
    %c0_48 = arith.constant 0 : index
    %c0_49 = arith.constant 0 : index
    %90 = vector.load %arg14[%c0_48, %c0_49] : memref<32x32xbf16, #tpu.memory_space<vmem>>, vector<32x32xbf16>
    %cst_50 = arith.constant dense<0.000000e+00> : vector<8x32xf32>
    %91 = tpu.matmul %89, %90, %cst_50 {dimension_numbers = #tpu.dot_dimension_numbers<[1], [0], [0], [1], [0, 0, 1, 1], [], []>} : vector<8x32xbf16>, vector<32x32xbf16>, vector<8x32xf32> -> vector<8x32xf32>
    %c0_51 = arith.constant 0 : index
    %c0_52 = arith.constant 0 : index
    %92 = vector.load %arg15[%c0_51, %c0_52] : memref<1x32xf32, #tpu.memory_space<vmem>>, vector<1x32xf32>
    %93 = vector.broadcast %92 : vector<1x32xf32> to vector<8x32xf32>
    %94 = arith.addf %91, %93 : vector<8x32xf32>
    %95 = arith.addf %94, %80 : vector<8x32xf32>
    %c0_53 = arith.constant 0 : index
    %c0_54 = arith.constant 0 : index
    %96 = vector.load %arg16[%c0_53, %c0_54] : memref<1x32xf32, #tpu.memory_space<vmem>>, vector<1x32xf32>
    %c0_55 = arith.constant 0 : index
    %c0_56 = arith.constant 0 : index
    %97 = vector.load %arg17[%c0_55, %c0_56] : memref<1x32xf32, #tpu.memory_space<vmem>>, vector<1x32xf32>
    %cst_57 = arith.constant dense<0.000000e+00> : vector<8xf32>
    %98 = vector.multi_reduction <add>, %95, %cst_57 [1] : vector<8x32xf32> to vector<8xf32>
    %99 = vector.shape_cast %98 : vector<8xf32> to vector<8x1xf32>
    %cst_58 = arith.constant 3.200000e+01 : f32
    %100 = vector.broadcast %cst_58 : f32 to vector<8x1xf32>
    %101 = arith.divf %99, %100 : vector<8x1xf32>
    %102 = vector.broadcast %101 : vector<8x1xf32> to vector<8x32xf32>
    %103 = arith.subf %95, %102 : vector<8x32xf32>
    %104 = arith.mulf %103, %103 : vector<8x32xf32>
    %cst_59 = arith.constant dense<0.000000e+00> : vector<8xf32>
    %105 = vector.multi_reduction <add>, %104, %cst_59 [1] : vector<8x32xf32> to vector<8xf32>
    %106 = vector.shape_cast %105 : vector<8xf32> to vector<8x1xf32>
    %cst_60 = arith.constant 0.0322580636 : f32
    %107 = vector.broadcast %cst_60 : f32 to vector<8x1xf32>
    %108 = arith.mulf %106, %107 : vector<8x1xf32>
    %109 = math.sqrt %108 : vector<8x1xf32>
    %110 = vector.broadcast %101 : vector<8x1xf32> to vector<8x32xf32>
    %111 = arith.subf %95, %110 : vector<8x32xf32>
    %cst_61 = arith.constant 1.000000e-03 : f32
    %112 = vector.broadcast %cst_61 : f32 to vector<8x1xf32>
    %113 = arith.addf %109, %112 : vector<8x1xf32>
    %114 = vector.broadcast %113 : vector<8x1xf32> to vector<8x32xf32>
    %115 = arith.divf %111, %114 : vector<8x32xf32>
    %116 = vector.broadcast %96 : vector<1x32xf32> to vector<8x32xf32>
    %117 = arith.mulf %115, %116 : vector<8x32xf32>
    %118 = vector.broadcast %97 : vector<1x32xf32> to vector<8x32xf32>
    %119 = arith.addf %117, %118 : vector<8x32xf32>
    %c0_62 = arith.constant 0 : index
    %c0_63 = arith.constant 0 : index
    %c0_64 = arith.constant 0 : index
    %120 = vector.load %arg18[%c0_62, %c0_63, %c0_64] : memref<1x8x32xf32, #tpu.memory_space<vmem>>, vector<1x8x32xf32>
    %121 = vector.shape_cast %120 : vector<1x8x32xf32> to vector<8x32xf32>
    %122 = vector.shape_cast %119 : vector<8x32xf32> to vector<1x8x32xf32>
    tpu.vector_store %arg18[%c0_62, %c0_63, %c0_64], %122 {strides = array<i32>} : memref<1x8x32xf32, #tpu.memory_space<vmem>>, vector<1x8x32xf32>,
    return
  }
  func.func @transform_0(%arg0: i32) -> (i32, i32, i32) {
    %c0_i32 = arith.constant 0 : i32
    %c0_i32_0 = arith.constant 0 : i32
    %c0_i32_1 = arith.constant 0 : i32
    return %arg0, %c0_i32, %c0_i32_0 : i32, i32, i32
  }
  func.func @transform_1(%arg0: i32) -> (i32, i32, i32) {
    %c0_i32 = arith.constant 0 : i32
    %c0_i32_0 = arith.constant 0 : i32
    %c0_i32_1 = arith.constant 0 : i32
    %c0_i32_2 = arith.constant 0 : i32
    return %c0_i32, %c0_i32_0, %c0_i32_1 : i32, i32, i32
  }
  func.func @transform_2(%arg0: i32) -> (i32, i32, i32) {
    %c0_i32 = arith.constant 0 : i32
    %c0_i32_0 = arith.constant 0 : i32
    %c0_i32_1 = arith.constant 0 : i32
    %c0_i32_2 = arith.constant 0 : i32
    return %c0_i32, %c0_i32_0, %c0_i32_1 : i32, i32, i32
  }
  func.func @transform_3(%arg0: i32) -> (i32, i32, i32) {
    %c0_i32 = arith.constant 0 : i32
    %c0_i32_0 = arith.constant 0 : i32
    %c0_i32_1 = arith.constant 0 : i32
    %c0_i32_2 = arith.constant 0 : i32
    return %c0_i32, %c0_i32_0, %c0_i32_1 : i32, i32, i32
  }
  func.func @transform_4(%arg0: i32) -> (i32, i32, i32) {
    %c0_i32 = arith.constant 0 : i32
    %c0_i32_0 = arith.constant 0 : i32
    %c0_i32_1 = arith.constant 0 : i32
    %c0_i32_2 = arith.constant 0 : i32
    return %c0_i32, %c0_i32_0, %c0_i32_1 : i32, i32, i32
  }
  func.func @transform_5(%arg0: i32) -> (i32, i32, i32) {
    %c0_i32 = arith.constant 0 : i32
    %c0_i32_0 = arith.constant 0 : i32
    %c0_i32_1 = arith.constant 0 : i32
    %c0_i32_2 = arith.constant 0 : i32
    return %c0_i32, %c0_i32_0, %c0_i32_1 : i32, i32, i32
  }
  func.func @transform_6(%arg0: i32) -> (i32, i32, i32) {
    %c0_i32 = arith.constant 0 : i32
    %c0_i32_0 = arith.constant 0 : i32
    %c0_i32_1 = arith.constant 0 : i32
    %c0_i32_2 = arith.constant 0 : i32
    return %c0_i32, %c0_i32_0, %c0_i32_1 : i32, i32, i32
  }
  func.func @transform_7(%arg0: i32) -> (i32, i32, i32) {
    %c0_i32 = arith.constant 0 : i32
    %c0_i32_0 = arith.constant 0 : i32
    %c0_i32_1 = arith.constant 0 : i32
    %c0_i32_2 = arith.constant 0 : i32
    return %c0_i32, %c0_i32_0, %c0_i32_1 : i32, i32, i32
  }
  func.func @transform_8(%arg0: i32) -> (i32, i32) {
    %c0_i32 = arith.constant 0 : i32
    %c0_i32_0 = arith.constant 0 : i32
    %c0_i32_1 = arith.constant 0 : i32
    return %c0_i32, %c0_i32_0 : i32, i32
  }
  func.func @transform_9(%arg0: i32) -> (i32, i32) {
    %c0_i32 = arith.constant 0 : i32
    %c0_i32_0 = arith.constant 0 : i32
    %c0_i32_1 = arith.constant 0 : i32
    return %c0_i32, %c0_i32_0 : i32, i32
  }
  func.func @transform_10(%arg0: i32) -> (i32, i32) {
    %c0_i32 = arith.constant 0 : i32
    %c0_i32_0 = arith.constant 0 : i32
    %c0_i32_1 = arith.constant 0 : i32
    return %c0_i32, %c0_i32_0 : i32, i32
  }
  func.func @transform_11(%arg0: i32) -> (i32, i32) {
    %c0_i32 = arith.constant 0 : i32
    %c0_i32_0 = arith.constant 0 : i32
    %c0_i32_1 = arith.constant 0 : i32
    return %c0_i32, %c0_i32_0 : i32, i32
  }
  func.func @transform_12(%arg0: i32) -> (i32, i32) {
    %c0_i32 = arith.constant 0 : i32
    %c0_i32_0 = arith.constant 0 : i32
    %c0_i32_1 = arith.constant 0 : i32
    return %c0_i32, %c0_i32_0 : i32, i32
  }
  func.func @transform_13(%arg0: i32) -> (i32, i32) {
    %c0_i32 = arith.constant 0 : i32
    %c0_i32_0 = arith.constant 0 : i32
    %c0_i32_1 = arith.constant 0 : i32
    return %c0_i32, %c0_i32_0 : i32, i32
  }
  func.func @transform_14(%arg0: i32) -> (i32, i32) {
    %c0_i32 = arith.constant 0 : i32
    %c0_i32_0 = arith.constant 0 : i32
    %c0_i32_1 = arith.constant 0 : i32
    return %c0_i32, %c0_i32_0 : i32, i32
  }
  func.func @transform_15(%arg0: i32) -> (i32, i32) {
    %c0_i32 = arith.constant 0 : i32
    %c0_i32_0 = arith.constant 0 : i32
    %c0_i32_1 = arith.constant 0 : i32
    return %c0_i32, %c0_i32_0 : i32, i32
  }
  func.func @transform_16(%arg0: i32) -> (i32, i32) {
    %c0_i32 = arith.constant 0 : i32
    %c0_i32_0 = arith.constant 0 : i32
    %c0_i32_1 = arith.constant 0 : i32
    return %c0_i32, %c0_i32_0 : i32, i32
  }
  func.func @transform_17(%arg0: i32) -> (i32, i32, i32) {
    %c0_i32 = arith.constant 0 : i32
    %c0_i32_0 = arith.constant 0 : i32
    %c0_i32_1 = arith.constant 0 : i32
    return %arg0, %c0_i32, %c0_i32_0 : i32, i32, i32
  }
}

</mosaic_0001>

<bundles_post_ra>
// kernel: tpu_custom_call.1
= control target key start
LH: loop header
LB: loop body
LE: loop exit
PB: predicated region body
PF: predicated region fallthrough
CT: control target
= control target key end

     0   :  { %s3578_s0 = inlined_call_operand.hbm [shape: f32[2,8,32], index: 0, kind: input, shape index: {}]   ;;  %s3579_s1 = inlined_call_operand.vmem [shape: bf16[4,16,32], index: 1, kind: input, shape index: {}]   ;;  %s3580_s2 = inlined_call_operand.hbm [shape: f32[4,1,16], index: 2, kind: input, shape index: {}]   ;;  %s3581_s3 = inlined_call_operand.vmem [shape: bf16[4,16,32], index: 3, kind: input, shape index: {}]   ;;  %s3582_s4 = inlined_call_operand.hbm [shape: f32[4,1,16], index: 4, kind: input, shape index: {}]   ;;  %s3583_s5 = inlined_call_operand.vmem [shape: bf16[4,16,32], index: 5, kind: input, shape index: {}]   ;;  %s3584_s6 = inlined_call_operand.hbm [shape: f32[4,1,16], index: 6, kind: input, shape index: {}]   ;;  %s3585_s7 = inlined_call_operand.vmem [shape: bf16[4,32,16], index: 7, kind: input, shape index: {}]   ;;  %s3586_s8 = inlined_call_operand.vmem [shape: f32[1,32], index: 8, kind: input, shape index: {}]   ;;  %s3587_s9 = inlined_call_operand.vmem [shape: f32[1,32], index: 9, kind: input, shape index: {}]   ;;  %s3588_s10 = inlined_call_operand.vmem [shape: f32[1,32], index: 10, kind: input, shape index: {}]   ;;  %s3589_s11 = inlined_call_operand.vmem [shape: bf16[32,32], index: 11, kind: input, shape index: {}]   ;;  %s3590_s12 = inlined_call_operand.vmem [shape: f32[1,32], index: 12, kind: input, shape index: {}]   ;;  %s3591_s13 = inlined_call_operand.vmem [shape: bf16[32,32], index: 13, kind: input, shape index: {}]   ;;  %s3592_s14 = inlined_call_operand.vmem [shape: f32[1,32], index: 14, kind: input, shape index: {}]   ;;  %s3593_s15 = inlined_call_operand.vmem [shape: f32[1,32], index: 15, kind: input, shape index: {}]   ;;  %s3594_s16 = inlined_call_operand.vmem [shape: f32[1,32], index: 16, kind: input, shape index: {}]   ;;  %s3595_s17 = inlined_call_operand.hbm [shape: f32[2,8,32], index: 17, kind: output, shape index: {}]  }
   0x1   :  { %3605 = sst [smem:[#allocation17_spill]] %s3578_s0 }
   0x2   :  { %3606 = sst [smem:[#allocation18_spill]] %s3579_s1 }
   0x3   :  { %3607 = sst [smem:[#allocation19_spill]] %s3580_s2 }
   0x4   :  { %3608 = sst [smem:[#allocation20_spill]] %s3581_s3 }
   0x5   :  { %3609 = sst [smem:[#allocation21_spill]] %s3582_s4 }
   0x6   :  { %3610 = sst [smem:[#allocation22_spill]] %s3588_s10 }
   0x7   :  { %3611 = sst [smem:[#allocation23_spill]] %s3590_s12 }
   0x8   :  { %3612 = sst [smem:[#allocation24_spill]] %s3591_s13 }
   0x9   :  { %3613 = sst [smem:[#allocation25_spill]] %s3592_s14 }
   0xa   :  { %3614 = sst [smem:[#allocation26_spill]] %s3593_s15 }
   0xb   :  { %3615 = sst [smem:[#allocation27_spill]] %s3594_s16 }
   0xc   :  { %3616 = sst [smem:[#allocation28_spill]] %s3595_s17 }
   0xd   :  { %22 = vsyncpa [#allocation3], 0 }
   0xe   :  { %24 = vsyncpa [#allocation3 + $0x1], 0 }
   0xf   :  { %25 = vsyncpa [#allocation6], 0 }
  0x10   :  { %26 = vsyncpa [#allocation9], 0 }
  0x11   :  { %27 = vsyncpa [#allocation4], 0 }
  0x12   :  { %29 = vsyncpa [#allocation4 + $0x1], 0  ;;  %s3056_s24 = smov 0   ;;  %s3058_s25 = smov 0  }
  0x13   :  { %s3060_s26 = smov 0   ;;  %s3062_s27 = smov 0  }
  0x14 LB: > { %3617 = sst [smem:[#allocation15_spill]] %s2943_s24  ;;  %s3077_s28 = sadd.s32 4294967295, %s2955_s27   ;;  %s2955_s27 = sphi %s3062_s27, %s3652_s27   ;;  %s2951_s26 = sphi %s3060_s26, %s3651_s26   ;;  %s2947_s25 = sphi %s3058_s25, %s3650_s25   ;;  %s2943_s24 = sphi %s3056_s24, %s3649_s24  }
  0x15   : > { %s2325_s29 = sadd.s32 4294967294, %s2955_s27   ;;  %p55_p0 = scmp.ne.s32.totalorder %s2947_s25, %s2943_s24 }
  0x16   : > { %p3601_p1 = scmp.eq.s32.totalorder %s3077_s28, 0  ;;  %p421_p3 = scmp.eq.s32.totalorder %s2325_s29, 1 }
  0x17   : > { %p2326_p5 = scmp.ge.s32.totalorder %s2955_s27, 1  ;;  %p428_p7 = scmp.lt.s32.totalorder %s2955_s27, 3 }
  0x18   : > { %p3086_p4 = por %p3601_p1, %p55_p0  ;;  %p3091_p6 = por %p421_p3, %p55_p0 }
  0x19   : > { %p3096_p8 = pnand %p2326_p5, %p428_p7  ;;  %s2957_s19 = smov [#allocation5]  }
  0x1a   : > { %s3618_s0 = scalar_select %p3086_p4, 1, 0 }
  0x1b   : > { %s3619_s30 = scalar_select %p3091_p6, 1, 0 }
  0x1c   : > { %s3621_s18 = scalar_select %p3096_p8, 1, 0 }
  0x1d   : > { %3620 = sst [smem:[#allocation16_spill]] %s3619_s30  ;;  %s443_s1 = sshll.u32 %s2957_s19, 4  ;;  %s3100_s1 = int_to_ptr.vmem [resolvable:$true] %s443_s1 }
  0x1e   : > { %p2654_p9 = pneg %p3096_p8  ;;  %s2958_s21 = smov [#allocation7]  }
  0x1f   : > { %s459_s22 = sshll.u32 %s2958_s21, 4  ;;  %s2959_s23 = smov [#allocation8]   ;;  %s3111_s22 = int_to_ptr.vmem [resolvable:$true] %s459_s22 }
  0x20   : > { %p3107_p11 = pnand %p2654_p9, %p3601_p1  ;;  %s3113_s29 = sshll.u32 %s2959_s23, 4  ;;  %s476_s29 = int_to_ptr.vmem [resolvable:$true] %s3113_s29 }
  0x21   : > { %s3623_s2 = sld [smem:[#allocation19_spill]] }
  0x22   : > { %p3123_p13 = pneg %p3107_p11 }
  0x27   : > { %s2767_s24 = scalar_lea.hbm %s3623_s2, 64 }
  0x28   : > { %p2768_p12 = scmp.ne.s32.totalorder %s3623_s2, %s2767_s24  ;;  %p2774_p5 = scmp.lt.u32.totalorder %s2767_s24, %s3623_s2 }
  0x2a   : > { %p2770_p0 = pnand %p3123_p13, %p2768_p12 }
  0x2c   : > { %p2771_p3 = pneg %p2770_p0 }
  0x2e   : > { %p2776_p7 = pnand %p2774_p5, %p2771_p3 }
  0x30   : > { %2779 = shalt.err (!%p2776_p7)
}
  0x31   : > { %s2780_s16 = scalar_lea.vmem %s3100_s1, 64  ;;  %p2788_p2 = scmp.lt.s32.totalorder %s3100_s1, %s3100_s1 }
  0x32   : > { %p2781_p9 = scmp.ne.s32.totalorder %s3100_s1, %s2780_s16  ;;  %p2789_p6 = scmp.lt.s32.totalorder %s2780_s16, %s2780_s16 }
  0x34   : > { %p2783_p10 = pnand %p2781_p9, %p3123_p13  ;;  %p2790_p12 = por %p2789_p6, %p2788_p2 }
  0x36   : > { %p2784_p1 = pneg %p2783_p10 }
  0x38   : > { %p2791_p0 = pnand %p2790_p12, %p2784_p1 }
  0x3a   : > { %2794 = shalt.err (!%p2791_p0)
}
  0x3b   : > { %s2960_s17 = smov 16   ;;  %s2961_s24 = smov 1  }
  0x3c   : > { %2657 = dma.hbm_to_vmem [thread:$0]  (!%p3107_p11), %s3623_s2, 64, %s3100_s1, [#allocation6], %s2960_s17, %s2960_s17, %s2961_s24  }
  0x3d   : > { %s3625_s4 = sld [smem:[#allocation21_spill]] }
  0x43   : > { %s2795_s16 = scalar_lea.hbm %s3625_s4, 64 }
  0x44   : > { %p2796_p1 = scmp.ne.s32.totalorder %s3625_s4, %s2795_s16  ;;  %p2802_p10 = scmp.lt.u32.totalorder %s2795_s16, %s3625_s4 }
  0x46   : > { %p2798_p2 = pnand %p2796_p1, %p3123_p13 }
  0x48   : > { %p2799_p6 = pneg %p2798_p2 }
  0x4a   : > { %p2804_p3 = pnand %p2802_p10, %p2799_p6 }
  0x4c   : > { %2807 = shalt.err (!%p2804_p3)
}
  0x4d   : > { %s2808_s1 = scalar_lea.vmem %s3111_s22, 64  ;;  %p2816_p12 = scmp.lt.s32.totalorder %s3111_s22, %s3111_s22 }
  0x4e   : > { %p2809_p5 = scmp.ne.s32.totalorder %s3111_s22, %s2808_s1  ;;  %p2817_p0 = scmp.lt.s32.totalorder %s2808_s1, %s2808_s1 }
  0x50   : > { %p2811_p7 = pnand %p2809_p5, %p3123_p13  ;;  %p2818_p1 = por %p2817_p0, %p2816_p12 }
  0x52   : > { %p2812_p9 = pneg %p2811_p7 }
  0x54   : > { %p2819_p2 = pnand %p2818_p1, %p2812_p9 }
  0x56   : > { %2822 = shalt.err (!%p2819_p2)
}
  0x57   : > { %2660 = dma.hbm_to_vmem [thread:$0]  (!%p3107_p11), %s3625_s4, 64, %s3111_s22, [#allocation6], %s2960_s17, %s2960_s17, %s2961_s24  }
  0x58   : > { %s2823_s30 = scalar_lea.hbm %s3584_s6, 64 }
  0x59   : > { %p2824_p6 = scmp.ne.s32.totalorder %s3584_s6, %s2823_s30  ;;  %p2830_p5 = scmp.lt.u32.totalorder %s2823_s30, %s3584_s6 }
  0x5b   : > { %p2826_p10 = pnand %p2824_p6, %p3123_p13 }
  0x5d   : > { %p2827_p3 = pneg %p2826_p10 }
  0x5f   : > { %p2832_p7 = pnand %p2830_p5, %p2827_p3 }
  0x61   : > { %2835 = shalt.err (!%p2832_p7)
}
  0x62   : > { %s2836_s1 = scalar_lea.vmem %s476_s29, 64  ;;  %p2844_p1 = scmp.lt.s32.totalorder %s476_s29, %s476_s29 }
  0x63   : > { %p2837_p9 = scmp.ne.s32.totalorder %s476_s29, %s2836_s1  ;;  %p2845_p2 = scmp.lt.s32.totalorder %s2836_s1, %s2836_s1 }
  0x65   : > { %p2839_p12 = pnand %p2837_p9, %p3123_p13  ;;  %p2846_p4 = por %p2845_p2, %p2844_p1 }
  0x67   : > { %p2840_p0 = pneg %p2839_p12 }
  0x69   : > { %p2847_p8 = pnand %p2846_p4, %p2840_p0 }
  0x6b   : > { %2850 = shalt.err (!%p2847_p8)
}
  0x6c   : > { %2663 = dma.hbm_to_vmem [thread:$0]  (!%p3107_p11), %s3584_s6, 64, %s476_s29, [#allocation9], %s2960_s17, %s2960_s17, %s2961_s24  }
  0x6d   : > { %s3196_s15 = sadd.s32 1, %s2955_s27   ;;  %s42_s12 = sadd.s32 1, %s2951_s26 }
  0x6e   : > { %s39_s20 = ssub.s32 %s2955_s27, %s3196_s15  ;;  %p49_p8 = scmp.ne.s32.totalorder %s2951_s26, %s2947_s25 }
  0x6f   : > { %p40_p4 = scmp.eq.s32.totalorder %s39_s20, 0  ;;  %p50_p13 = scmp.eq.s32.totalorder %s2955_s27, 0 }
  0x70   : > { %p2675_p6 = scmp.lt.s32.totalorder %s2955_s27, 2  ;;  %p3626_p3 = scmp.eq.s32.totalorder %s3077_s28, 1 }
  0x71   : > { %s3206_s13 = scalar_select %p40_p4, %s2951_s26, %s42_s12  }
  0x72   : > { %p51_p10 = por %p50_p13, %p49_p8  ;;  %p3210_p5 = por %p3626_p3, %p49_p8 }
  0x73   : > { %s519_s30 = sand.u32 1, %s2951_s26   ;;  %s2332_s19 = sshll.u32 %s2955_s27, 7 }
  0x74   : > { %s2331_s29 = sshll.u32 %s519_s30, 3  ;;  %s3628_s21 = sld [smem:[#allocation17_spill]] }
  0x75   : > { %s523_s16 = scalar_lea.vmem [#allocation2], %s2331_s29  ;;  %p3221_p11 = pnand %p2675_p6, %p51_p10 }
  0x76   : > { %s530_s1 = sshll.u32 %s523_s16, 4  ;;  %s520_s10 = scalar_lea.sflag [#allocation3], %s519_s30  ;;  %s3225_s1 = int_to_ptr.vmem [resolvable:$true] %s530_s1 }
  0x77   : > { %p2853_p9 = pneg %p3221_p11 }
  0x7a   : > { %s3219_s23 = scalar_lea.hbm %s3628_s21, %s2332_s19  ;;  %s2856_s29 = scalar_lea.hbm %s3628_s21, 256 }
  0x7b   : > { %s2851_s20 = scalar_lea.hbm %s3219_s23, 128  ;;  %p2857_p1 = scmp.lt.u32.totalorder %s3219_s23, %s3628_s21 }
  0x7c   : > { %p2852_p7 = scmp.ne.s32.totalorder %s3219_s23, %s2851_s20  ;;  %p2858_p2 = scmp.lt.u32.totalorder %s2856_s29, %s2851_s20 }
  0x7d   : > { %p2860_p8 = scmp.lt.u32.totalorder %s2851_s20, %s3219_s23 }
  0x7e   : > { %p2854_p12 = pnand %p2853_p9, %p2852_p7  ;;  %p2859_p4 = por %p2858_p2, %p2857_p1 }
  0x80   : > { %p2855_p0 = pneg %p2854_p12  ;;  %p2861_p13 = por %p2860_p8, %p2859_p4 }
  0x82   : > { %p2862_p6 = pnand %p2861_p13, %p2855_p0 }
  0x84   : > { %2865 = shalt.err (!%p2862_p6)
}
  0x85   : > { %s2866_s30 = scalar_lea.vmem %s3225_s1, 128  ;;  %s2962_s16 = smov [#allocation2]  }
  0x86   : > { %p2867_p10 = scmp.ne.s32.totalorder %s3225_s1, %s2866_s30  ;;  %s2871_s12 = sshll.u32 %s2962_s16, 4  ;;  %s2872_s12 = int_to_ptr.vmem [resolvable:$false] %s2871_s12 }
  0x87   : > { %s2873_s19 = scalar_lea.vmem %s2872_s12, 256  ;;  %p2874_p12 = scmp.lt.s32.totalorder %s3225_s1, %s2872_s12 }
  0x88   : > { %p2869_p3 = pnand %p2867_p10, %p2853_p9  ;;  %p2875_p1 = scmp.lt.s32.totalorder %s2873_s19, %s2866_s30 }
  0x8a   : > { %p2870_p7 = pneg %p2869_p3  ;;  %p2876_p2 = por %p2875_p1, %p2874_p12 }
  0x8c   : > { %p2877_p4 = pnand %p2876_p2, %p2870_p7 }
  0x8e   : > { %2880 = shalt.err (!%p2877_p4)
}
  0x8f   : > { %2667 = dma.hbm_to_vmem [thread:$0]  (!%p3221_p11), %s3219_s23, 128, %s3225_s1, %s520_s10  }
  0x90   : > { %p3630_p0 = scmp.ne.s32.totalorder %s3621_s18, 0 }
  0x91   : > { %s3255_s20 = sand.u32 (!%p3630_p0), 1, %s2947_s25   ;;  %p3631_p9 = scmp.ne.s32.totalorder (!%p3630_p0), %s3618_s0, 0 }
  0x92   : > { %539 = sbr.rel (%p3630_p0) target bundleno = 2504 (0x9c8), region = 88  ;;  %s2334_s29 = sshll.u32 (!%p3630_p0), %s3255_s20, 3 }
  0x93   : > { %s542_s17 = scalar_lea.sflag (!%p3630_p0), [#allocation3], %s3255_s20  ;;  %s545_s24 = scalar_lea.vmem (!%p3630_p0), [#allocation2], %s2334_s29 }
  0x99   : > { %2926 = dma.done.wait (%p3631_p9), %s542_s17, 128  }
  0x9a   : > { %2928 = vsyncadd (%p3631_p9), %s542_s17, 4294967168  ;;  %p3632_p11 = scmp.eq.s32.totalorder %s3077_s28, 0 }
  0x9c   : > { %2930 = dma.done.wait (%p3632_p11), [#allocation6], 128   ;;  %p3633_p8 = pmov %p3632_p11 }
  0x9e   : > { %2932 = vsyncadd (%p3633_p8), [#allocation6], 4294967168  ;;  %p3634_p13 = pmov %p3633_p8 }
  0x9f   : > { %p3635_p6 = pmov %p3633_p8 }
  0xa0   : > { %2934 = dma.done.wait (%p3634_p13), [#allocation9], 64  }
  0xa1   : > { %2936 = vsyncadd (%p3635_p6), [#allocation9], 4294967232  ;;  %v2963_v0 = vmov 0.0   ;;  %vm2964_vm0 = vmmov 0   ;;  %vm652_vm1 = vcmask 261120   ;;  %s3636_s23 = sld [smem:[#allocation18_spill]] }
  0xa2   : > { %2470 = vmatprep.subr.bf16.mxu0 %v2963_v0  ;;  %2476 = vmatprep.subr.bf16.mxu1 %v2963_v0  ;;  %v3286_v4 = vld [vmem:[%s545_s24] sm:$0xff]  ;;  %s3637_s3 = sld [smem:[#allocation20_spill]]  ;;  %v2729_v23 = vld [vmem:[%s3583_s5 + $0x10] sm:$0xff]   ;;  %v2730_v25 = vld [vmem:[%s3583_s5 + $0x18] sm:$0xff]   ;;  %vm1307_vm2 = vcmask 130048   ;;  %vm1552_vm3 = vcmask 1043456  }
  0xa3   : > { %2472 = vmatprep.mubr.msk.bf16.mxu0 %vm2964_vm0, %v2963_v0  ;;  %2478 = vmatprep.mubr.msk.bf16.mxu1 %vm2964_vm0, %v2963_v0  ;;  %v610_v9 = vpack.c.bf16 %v3286_v4, %v3286_v4  ;;  %v2727_v19 = vld [vmem:[%s3583_s5] sm:$0xff]   ;;  %v2728_v21 = vld [vmem:[%s3583_s5 + $0x8] sm:$0xff]   ;;  %v1209_v24 = vsel %vm652_vm1, %v2729_v23, 0  ;;  %v1257_v26 = vsel %vm652_vm1, %v2730_v25, 0  ;;  %v2351_v43 = vld [vmem:[#allocation7] ss:$0 sm:$0xff] }
  0xa4   : > { %v1113_v20 = vsel %vm652_vm1, %v2727_v19, 0  ;;  %v1161_v22 = vsel %vm652_vm1, %v2728_v21, 0  ;;  %v2352_v44 = vld [vmem:[#allocation7 + $0x1] ss:$0 sm:$0xff]  ;;  %v2339_v55 = vld [vmem:[#allocation5] ss:$0 sm:$0xff] }
  0xa5   : > { %v2340_v58 = vld [vmem:[#allocation5 + $0x1] ss:$0 sm:$0xff]  ;;  %v2353_v61 = vld [vmem:[#allocation7 + $0x2] ss:$0 sm:$0xff]  ;;  %v2354_v63 = vld [vmem:[#allocation7 + $0x3] ss:$0 sm:$0xff] }
  0xa6   : > { %v2363_v25 = vld [vmem:[#allocation8] ss:$0 sm:$0xff]  ;;  %vm1496_vm4 = vcmask 64512   ;;  %s3638_s16 = sld [smem:[#allocation22_spill]]  ;;  %s3639_s17 = sld [smem:[#allocation24_spill]] }
  0xa7   : > { %v2719_v1 = vld [vmem:[%s3636_s23] sm:$0xff]   ;;  %v2720_v2 = vld [vmem:[%s3636_s23 + $0x8] sm:$0xff]   ;;  %v2721_v6 = vld [vmem:[%s3636_s23 + $0x10] sm:$0xff]   ;;  %s3640_s22 = sld [smem:[#allocation23_spill]]  ;;  %s3642_s24 = sld [smem:[#allocation26_spill]] }
  0xa8   : > { %v657_v3 = vsel %vm652_vm1, %v2719_v1, 0  ;;  %v705_v5 = vsel %vm652_vm1, %v2720_v2, 0  ;;  %v2722_v7 = vld [vmem:[%s3636_s23 + $0x18] sm:$0xff]   ;;  %v2723_v8 = vld [vmem:[%s3637_s3] sm:$0xff]   ;;  %v2724_v10 = vld [vmem:[%s3637_s3 + $0x8] sm:$0xff]   ;;  %v753_v11 = vsel %vm652_vm1, %v2721_v6, 0 }
  0xa9   : > { %2471 = vmatpush3.bf16.xpose.msra.mxu0 %v657_v3  ;;  %2477 = vmatpush3.bf16.xpose.msra.mxu1 %v705_v5  ;;  %v801_v12 = vsel %vm652_vm1, %v2722_v7, 0  ;;  %v885_v13 = vsel %vm652_vm1, %v2723_v8, 0  ;;  %v933_v14 = vsel %vm652_vm1, %v2724_v10, 0  ;;  %v2725_v15 = vld [vmem:[%s3637_s3 + $0x10] sm:$0xff]   ;;  %v2726_v16 = vld [vmem:[%s3637_s3 + $0x18] sm:$0xff]   ;;  %s3643_s1 = sld [smem:[#allocation27_spill]] }
  0xaa   : > { %2482 = vmatprep.subr.bf16.mxu0 %v2963_v0  ;;  %2488 = vmatprep.subr.bf16.mxu1 %v2963_v0  ;;  %v981_v17 = vsel %vm652_vm1, %v2725_v15, 0  ;;  %v1029_v18 = vsel %vm652_vm1, %v2726_v16, 0  ;;  %v2341_v15 = vld [vmem:[#allocation5 + $0x2] ss:$0 sm:$0xff]  ;;  %s607_s10 = scalar_lea.vmem [#allocation10], %s2334_s29  ;;  %s3644_s3 = sld [smem:[#allocation28_spill]] }
  0xab   : > { %s2226_s30 = sshll.u32 %s607_s10, 4  ;;  %s2213_s12 = scalar_lea.sflag [#allocation4], %s3255_s20  ;;  %s3535_s30 = int_to_ptr.vmem [resolvable:$true] %s2226_s30 }
  0xac   : > { %s2881_s19 = scalar_lea.vmem %s3535_s30, 128 }
  0xad   : > { %p2882_p10 = scmp.ne.s32.totalorder %s3535_s30, %s2881_s19 }
  0xaf   : > { %p2883_p3 = pnand %p2882_p10, %p3210_p5 }
  0xb0   : > { %2473 = vmatmul.mubr.msk.bf16.vlgmr.msra.gmra.mrb[0].mxu0 %vm652_vm1, %v610_v9  ;;  %2479 = vmatmul.mubr.msk.bf16.vlgmr.msra.gmra.mrb[0].mxu1 %vm652_vm1, %v610_v9 }
  0xb1   : > { %2483 = vmatpush3.bf16.xpose.msra.mxu0 %v753_v11  ;;  %2489 = vmatpush3.bf16.xpose.msra.mxu1 %v801_v12  ;;  %p2884_p7 = pneg %p2883_p3 }
  0xb2   : > { %2484 = vmatprep.mubr.msk.bf16.mxu0 %vm2964_vm0, %v2963_v0  ;;  %2490 = vmatprep.mubr.msk.bf16.mxu1 %vm2964_vm0, %v2963_v0 }
  0xb3   : > { %2494 = vmatprep.subr.bf16.mxu0 %v2963_v0  ;;  %2500 = vmatprep.subr.bf16.mxu1 %v2963_v0 }
  0xb8   : > { %2485 = vmatmul.mubr.msk.bf16.vlgmr.msra.gmra.mrb[4].mxu0 %vm652_vm1, %v610_v9  ;;  %2491 = vmatmul.mubr.msk.bf16.vlgmr.msra.gmra.mrb[4].mxu1 %vm652_vm1, %v610_v9 }
  0xb9   : > { %2495 = vmatpush3.bf16.xpose.msra.mxu0 %v885_v13  ;;  %2501 = vmatpush3.bf16.xpose.msra.mxu1 %v933_v14 }
  0xba   : > { %2496 = vmatprep.mubr.msk.bf16.mxu0 %vm2964_vm0, %v2963_v0  ;;  %2502 = vmatprep.mubr.msk.bf16.mxu1 %vm2964_vm0, %v2963_v0 }
  0xbb   : > { %2506 = vmatprep.subr.bf16.mxu0 %v2963_v0  ;;  %2512 = vmatprep.subr.bf16.mxu1 %v2963_v0 }
  0xc0   : > { %2497 = vmatmul.mubr.msk.bf16.vlgmr.msra.gmra.mrb[8].mxu0 %vm652_vm1, %v610_v9  ;;  %2503 = vmatmul.mubr.msk.bf16.vlgmr.msra.gmra.mrb[8].mxu1 %vm652_vm1, %v610_v9 }
  0xc1   : > { %2507 = vmatpush3.bf16.xpose.msra.mxu0 %v981_v17  ;;  %2513 = vmatpush3.bf16.xpose.msra.mxu1 %v1029_v18  ;;  %v2342_v18 = vld [vmem:[#allocation5 + $0x3] ss:$0 sm:$0xff] }
  0xc2   : > { %2508 = vmatprep.mubr.msk.bf16.mxu0 %vm2964_vm0, %v2963_v0  ;;  %2514 = vmatprep.mubr.msk.bf16.mxu1 %vm2964_vm0, %v2963_v0 }
  0xc3   : > { %2518 = vmatprep.subr.bf16.mxu0 %v2963_v0  ;;  %2524 = vmatprep.subr.bf16.mxu1 %v2963_v0 }
  0xc8   : > { %2509 = vmatmul.mubr.msk.bf16.vlgmr.msra.gmra.mrb[12].mxu0 %vm652_vm1, %v610_v9  ;;  %2515 = vmatmul.mubr.msk.bf16.vlgmr.msra.gmra.mrb[12].mxu1 %vm652_vm1, %v610_v9 }
  0xc9   : > { %2520 = vmatprep.mubr.msk.bf16.mxu0 %vm2964_vm0, %v2963_v0  ;;  %2526 = vmatprep.mubr.msk.bf16.mxu1 %vm2964_vm0, %v2963_v0 }
  0xca   : > { %2519 = vmatpush3.bf16.xpose.msra.mxu0 %v1113_v20  ;;  %2525 = vmatpush3.bf16.xpose.msra.mxu1 %v1161_v22 }
  0xcb   : > { %2530 = vmatprep.subr.bf16.mxu0 %v2963_v0  ;;  %2536 = vmatprep.subr.bf16.mxu1 %v2963_v0 }
  0xd1   : > { %2521 = vmatmul.mubr.msk.bf16.vlgmr.msra.gmra.mrb[16].mxu0 %vm652_vm1, %v610_v9  ;;  %2527 = vmatmul.mubr.msk.bf16.vlgmr.msra.gmra.mrb[16].mxu1 %vm652_vm1, %v610_v9 }
  0xd2   : > { %2531 = vmatpush3.bf16.xpose.msra.mxu0 %v1209_v24  ;;  %2532 = vmatprep.mubr.msk.bf16.mxu0 %vm2964_vm0, %v2963_v0 }
  0xd3   : > { %2542 = vmatprep.subr.bf16.mxu0 %v2963_v0  ;;  %2537 = vmatpush3.bf16.xpose.msra.mxu1 %v1257_v26 }
  0xd4   : > { %2538 = vmatprep.mubr.msk.bf16.mxu1 %vm2964_vm0, %v2963_v0  ;;  %2548 = vmatprep.subr.bf16.mxu1 %v2963_v0 }
  0xd9   : > { %2533 = vmatmul.mubr.msk.bf16.vlgmr.msra.gmra.mrb[20].mxu0 %vm652_vm1, %v610_v9 }
  0xda   : > { %2544 = vmatprep.mubr.msk.bf16.mxu0 %vm2964_vm0, %v2963_v0  ;;  %2539 = vmatmul.mubr.msk.bf16.vlgmr.msra.gmra.mrb[20].mxu1 %vm652_vm1, %v610_v9 }
  0xdb   : > { %2550 = vmatprep.mubr.msk.bf16.mxu1 %vm2964_vm0, %v2963_v0 }
 0x183   : > { %v693_v27 = vpop.f32.mrb[0].mxu0  ;;  %v741_v29 = vpop.f32.mrb[0].mxu1 }
 0x184   : > { %v2474_v28 = vpop.f32.mrb[1].mxu0  ;;  %v2480_v31 = vpop.f32.mrb[1].mxu1  ;;  %v694_v62 = vadd.f32 %v2339_v55, %v693_v27  ;;  %v742_v1 = vadd.f32 %v2340_v58, %v741_v29  ;;  %v2364_v29 = vld [vmem:[#allocation8 + $0x1] ss:$0 sm:$0xff] }
 0x185   : > { %v696_v30 = vpop.f32.mrb[2].mxu0  ;;  %v744_v33 = vpop.f32.mrb[2].mxu1 }
 0x186   : > { %v2475_v32 = vpop.f32.mrb[3].mxu0  ;;  %v2481_v34 = vpop.f32.mrb[3].mxu1  ;;  %v1299_v10 = vpack.c.bf16 %v694_v62, %v694_v62  ;;  %v1300_v14 = vpack.c.bf16 %v742_v1, %v742_v1 }
 0x18b   : > { %v789_v35 = vpop.f32.mrb[4].mxu0  ;;  %v837_v37 = vpop.f32.mrb[4].mxu1 }
 0x18c   : > { %v2486_v36 = vpop.f32.mrb[5].mxu0  ;;  %v2492_v39 = vpop.f32.mrb[5].mxu1  ;;  %v790_v21 = vadd.f32 %v2341_v15, %v789_v35  ;;  %v838_v22 = vadd.f32 %v2342_v18, %v837_v37 }
 0x18d   : > { %v792_v38 = vpop.f32.mrb[6].mxu0  ;;  %v840_v41 = vpop.f32.mrb[6].mxu1 }
 0x18e   : > { %v2487_v40 = vpop.f32.mrb[7].mxu0  ;;  %v2493_v42 = vpop.f32.mrb[7].mxu1  ;;  %v1301_v23 = vpack.c.bf16 %v790_v21, %v790_v21  ;;  %v1302_v24 = vpack.c.bf16 %v838_v22, %v838_v22 }
 0x18f   : > { %v2365_v40 = vld [vmem:[#allocation8 + $0x2] ss:$0 sm:$0xff] }
 0x193   : > { %v921_v45 = vpop.f32.mrb[8].mxu0  ;;  %v969_v47 = vpop.f32.mrb[8].mxu1 }
 0x194   : > { %v922_v46 = vadd.f32 %v2351_v43, %v921_v45  ;;  %v2498_v48 = vpop.f32.mrb[9].mxu0  ;;  %v970_v49 = vadd.f32 %v2352_v44, %v969_v47  ;;  %v2504_v51 = vpop.f32.mrb[9].mxu1  ;;  %v2366_v45 = vld [vmem:[#allocation8 + $0x3] ss:$0 sm:$0xff] }
 0x195   : > { %v924_v50 = vpop.f32.mrb[10].mxu0  ;;  %v972_v54 = vpop.f32.mrb[10].mxu1 }
 0x196   : > { %v1303_v52 = vpack.c.bf16 %v922_v46, %v922_v46  ;;  %v2499_v53 = vpop.f32.mrb[11].mxu0  ;;  %v1304_v56 = vpack.c.bf16 %v970_v49, %v970_v49  ;;  %v2505_v57 = vpop.f32.mrb[11].mxu1 }
 0x198   : > { %v1312_v59 = vsel %vm1307_vm2, %v1303_v52, 0  ;;  %v1358_v60 = vsel %vm1307_vm2, %v1304_v56, 0 }
 0x199   : > { %2543 = vmatpush3.bf16.xpose.msra.mxu0 %v1312_v59  ;;  %2549 = vmatpush3.bf16.xpose.msra.mxu1 %v1358_v60 }
 0x19a   : > { %2554 = vmatprep.subr.bf16.mxu0 %v2963_v0  ;;  %2560 = vmatprep.subr.bf16.mxu1 %v2963_v0 }
 0x19b   : > { %v1017_v2 = vpop.f32.mrb[12].mxu0  ;;  %v1065_v5 = vpop.f32.mrb[12].mxu1 }
 0x19c   : > { %v1018_v3 = vadd.f32 %v2353_v61, %v1017_v2  ;;  %v2510_v6 = vpop.f32.mrb[13].mxu0  ;;  %v1066_v7 = vadd.f32 %v2354_v63, %v1065_v5  ;;  %v2516_v9 = vpop.f32.mrb[13].mxu1 }
 0x19d   : > { %v1020_v8 = vpop.f32.mrb[14].mxu0  ;;  %v1068_v13 = vpop.f32.mrb[14].mxu1 }
 0x19e   : > { %v1305_v11 = vpack.c.bf16 %v1018_v3, %v1018_v3  ;;  %v2511_v12 = vpop.f32.mrb[15].mxu0  ;;  %v1306_v16 = vpack.c.bf16 %v1066_v7, %v1066_v7  ;;  %v2517_v17 = vpop.f32.mrb[15].mxu1 }
 0x1a0   : > { %v1404_v19 = vsel %vm1307_vm2, %v1305_v11, 0  ;;  %2545 = vmatmul.mubr.msk.bf16.vlgmr.msra.gmra.mrb[24].mxu0 %vm1307_vm2, %v1299_v10  ;;  %v1450_v20 = vsel %vm1307_vm2, %v1306_v16, 0  ;;  %2551 = vmatmul.mubr.msk.bf16.vlgmr.msra.gmra.mrb[24].mxu1 %vm1307_vm2, %v1300_v14 }
 0x1a1   : > { %2555 = vmatpush3.bf16.xpose.msra.mxu0 %v1404_v19  ;;  %2561 = vmatpush3.bf16.xpose.msra.mxu1 %v1450_v20 }
 0x1a2   : > { %2556 = vmatprep.mubr.msk.bf16.mxu0 %vm2964_vm0, %v2963_v0  ;;  %2562 = vmatprep.mubr.msk.bf16.mxu1 %vm2964_vm0, %v2963_v0 }
 0x1a3   : > { %2566 = vmatprep.subr.bf16.mxu0 %v2963_v0  ;;  %2572 = vmatprep.subr.bf16.mxu1 %v2963_v0 }
 0x1a4   : > { %v1149_v26 = vpop.f32.mrb[16].mxu0  ;;  %v1197_v33 = vpop.f32.mrb[16].mxu1 }
 0x1a5   : > { %v1150_v27 = vadd.f32 %v2363_v25, %v1149_v26  ;;  %v2522_v28 = vpop.f32.mrb[17].mxu0  ;;  %v1198_v34 = vadd.f32 %v2364_v29, %v1197_v33  ;;  %v2528_v35 = vpop.f32.mrb[17].mxu1 }
 0x1a6   : > { %v1152_v30 = vpop.f32.mrb[18].mxu0  ;;  %v1200_v37 = vpop.f32.mrb[18].mxu1 }
 0x1a7   : > { %v1545_v31 = vpack.c.bf16 %v1150_v27, %v1150_v27  ;;  %v2523_v32 = vpop.f32.mrb[19].mxu0  ;;  %v1546_v38 = vpack.c.bf16 %v1198_v34, %v1198_v34  ;;  %v2529_v39 = vpop.f32.mrb[19].mxu1 }
 0x1a8   : > { %2557 = vmatmul.mubr.msk.bf16.vlgmr.msra.gmra.mrb[28].mxu0 %vm1307_vm2, %v1301_v23  ;;  %2563 = vmatmul.mubr.msk.bf16.vlgmr.msra.gmra.mrb[28].mxu1 %vm1307_vm2, %v1302_v24 }
 0x1a9   : > { %2568 = vmatprep.mubr.msk.bf16.mxu0 %vm2964_vm0, %v2963_v0  ;;  %2574 = vmatprep.mubr.msk.bf16.mxu1 %vm2964_vm0, %v2963_v0  ;;  %v1554_v36 = vsel %vm1552_vm3, %v1545_v31, 0  ;;  %v1600_v41 = vsel %vm1552_vm3, %v1546_v38, 0 }
 0x1aa   : > { %2567 = vmatpush3.bf16.msra.mxu0 %v1554_v36  ;;  %2573 = vmatpush3.bf16.msra.mxu1 %v1600_v41 }
 0x1ab   : > { %2578 = vmatprep.subr.bf16.mxu0 %v2963_v0  ;;  %2584 = vmatprep.subr.bf16.mxu1 %v2963_v0 }
 0x1ac   : > { %v1245_v42 = vpop.f32.mrb[20].mxu0 }
 0x1ad   : > { %v1246_v43 = vadd.f32 %v2365_v40, %v1245_v42  ;;  %v2534_v44 = vpop.f32.mrb[21].mxu0  ;;  %v1293_v49 = vpop.f32.mrb[20].mxu1 }
 0x1ae   : > { %v1248_v46 = vpop.f32.mrb[22].mxu0  ;;  %v1294_v50 = vadd.f32 %v2366_v45, %v1293_v49  ;;  %v2540_v51 = vpop.f32.mrb[21].mxu1 }
 0x1af   : > { %v1547_v47 = vpack.c.bf16 %v1246_v43, %v1246_v43  ;;  %v2535_v48 = vpop.f32.mrb[23].mxu0  ;;  %v1296_v53 = vpop.f32.mrb[22].mxu1 }
 0x1b0   : > { %v1548_v54 = vpack.c.bf16 %v1294_v50, %v1294_v50  ;;  %v2541_v55 = vpop.f32.mrb[23].mxu1  ;;  %v2731_v50 = vld [vmem:[%s3585_s7] sm:$0xff]  }
 0x1b1   : > { %v3404_v52 = vsel %vm1552_vm3, %v1547_v47, 0  ;;  %v2732_v55 = vld [vmem:[%s3585_s7 + $0x10] sm:$0xff]  }
 0x1b2   : > { %v3407_v56 = vsel %vm1552_vm3, %v1548_v54, 0  ;;  %v1768_v54 = vsel %vm1307_vm2, %v2731_v50, 0 }
 0x273   : > { %v1348_v57 = vpop.f32.mrb[24].mxu0  ;;  %v1394_v59 = vpop.f32.mrb[24].mxu1 }
 0x274   : > { %v1492_v58 = vmul.f32 0.25, %v1348_v57  ;;  %v2546_v60 = vpop.f32.mrb[25].mxu0  ;;  %v2552_v61 = vpop.f32.mrb[25].mxu1  ;;  %v1493_v63 = vmul.f32 0.25, %v1394_v59  ;;  %v2733_v59 = vld [vmem:[%s3585_s7 + $0x8] sm:$0xff]  }
 0x275   : > { %v1351_v62 = vpop.f32.mrb[26].mxu0  ;;  %v1397_v1 = vpop.f32.mrb[26].mxu1  ;;  %v1771_v60 = vsel %vm1307_vm2, %v2733_v59, 0  ;;  %v2734_v61 = vld [vmem:[%s3585_s7 + $0x18] sm:$0xff]  }
 0x276   : > { %v2547_v2 = vpop.f32.mrb[27].mxu0  ;;  %v1497_v3 = vsel %vm1496_vm4, %v1492_v58, -inf  ;;  %v2553_v5 = vpop.f32.mrb[27].mxu1  ;;  %v1500_v6 = vsel %vm1496_vm4, %v1493_v63, -inf  ;;  %v1830_v62 = vsel %vm1307_vm2, %v2734_v61, 0 }
 0x277   : > { %1498 = vmax.xlane.f32.xlu0 %v1497_v3 }
 0x27b   : > { %1501 = vmax.xlane.f32.xlu0 %v1500_v6  ;;  %v1440_v7 = vpop.f32.mrb[28].mxu0  ;;  %v1486_v8 = vpop.f32.mrb[28].mxu1  ;;  %v2736_v6 = vld [vmem:[%s3585_s7 + $0x30] sm:$0xff]  }
 0x27c   : > { %v1494_v9 = vmul.f32 0.25, %v1440_v7  ;;  %v2558_v10 = vpop.f32.mrb[29].mxu0  ;;  %v2564_v11 = vpop.f32.mrb[29].mxu1  ;;  %v1495_v13 = vmul.f32 0.25, %v1486_v8 }
 0x27d   : > { %v1443_v12 = vpop.f32.mrb[30].mxu0  ;;  %v1489_v14 = vpop.f32.mrb[30].mxu1 }
 0x27e   : > { %v2559_v15 = vpop.f32.mrb[31].mxu0  ;;  %v1503_v16 = vsel %vm1496_vm4, %v1494_v9, -inf  ;;  %v2565_v17 = vpop.f32.mrb[31].mxu1  ;;  %v1506_v18 = vsel %vm1496_vm4, %v1495_v13, -inf  ;;  %v1945_v12 = vsel %vm1307_vm2, %v2736_v6, 0 }
 0x27f   : > { %1504 = vmax.xlane.f32.xlu1 %v1503_v16 }
 0x283   : > { %1507 = vmax.xlane.f32.xlu1 %v1506_v18 }
 0x304   : > { %v1499_v19 = vpop.xlane.xlu0 %1498 }
 0x305   : > { %v1509_v20 = vsub.f32 %v1492_v58, %v1499_v19  ;;  %v1827_v58 = vsel %vm1307_vm2, %v2732_v55, 0  ;;  %v2738_v19 = vld [vmem:[%s3585_s7 + $0x38] sm:$0xff]  }
 0x307   : > { %v1513_v21 = vmul.f32 1.442695, %v1509_v20 }
 0x308   : > { %v1502_v22 = vpop.xlane.xlu0 %1501 }
 0x309   : > { %2743 = vpow2.f32 %v1513_v21  ;;  %v1510_v23 = vsub.f32 %v1493_v63, %v1502_v22  ;;  %v2735_v63 = vld [vmem:[%s3585_s7 + $0x20] sm:$0xff]  }
 0x30a   : > { %v1886_v5 = vsel %vm1307_vm2, %v2735_v63, 0 }
 0x30b   : > { %v1515_v24 = vmul.f32 1.442695, %v1510_v23 }
 0x30c   : > { %v1505_v25 = vpop.xlane.xlu1 %1504 }
 0x30d   : > { %2745 = vpow2.f32 %v1515_v24  ;;  %v1511_v26 = vsub.f32 %v1494_v9, %v1505_v25  ;;  %v1948_v24 = vsel %vm1307_vm2, %v2738_v19, 0 }
 0x30f   : > { %v1517_v27 = vmul.f32 1.442695, %v1511_v26 }
 0x310   : > { %v1508_v28 = vpop.xlane.xlu1 %1507 }
 0x311   : > { %2747 = vpow2.f32 %v1517_v27  ;;  %v1512_v29 = vsub.f32 %v1495_v13, %v1508_v28  ;;  %v2737_v13 = vld [vmem:[%s3585_s7 + $0x28] sm:$0xff]  }
 0x312   : > { %v1889_v18 = vsel %vm1307_vm2, %v2737_v13, 0  ;;  %v2398_v13 = vld [vmem:[%s3640_s22] ss:$0 sm:$0xff]  ;;  %s2409_s22 = sshll.u32 %s3077_s28, 7  ;;  %s2965_s28 = smov [#allocation10]  }
 0x313   : > { %v2744_v30 = vpop.eup %2743  ;;  %v1519_v31 = vmul.f32 1.442695, %v1512_v29  ;;  %s3533_s4 = scalar_lea.hbm %s3644_s3, %s2409_s22  ;;  %s2885_s29 = sshll.u32 %s2965_s28, 4  ;;  %s2886_s29 = int_to_ptr.vmem [resolvable:$false] %s2885_s29 }
 0x314   : > { %v1521_v32 = vsel %vm1496_vm4, %v2744_v30, 0.0  ;;  %p2888_p12 = scmp.lt.s32.totalorder %s3535_s30, %s2886_s29 }
 0x315   : > { %2749 = vpow2.f32 %v1519_v31  ;;  %1522 = vadd.xlane.f32.xlu0 %v1521_v32 }
 0x317   : > { %v2746_v33 = vpop.eup %2745 }
 0x318   : > { %v1524_v34 = vsel %vm1496_vm4, %v2746_v33, 0.0 }
 0x319   : > { %1525 = vadd.xlane.f32.xlu1 %v1524_v34 }
 0x31b   : > { %v2748_v35 = vpop.eup %2747 }
 0x31c   : > { %v1527_v36 = vsel %vm1496_vm4, %v2748_v35, 0.0 }
 0x31d   : > { %1528 = vadd.xlane.f32.xlu0 %v1527_v36 }
 0x31f   : > { %v2750_v37 = vpop.eup %2749 }
 0x320   : > { %v1530_v38 = vsel %vm1496_vm4, %v2750_v37, 0.0 }
 0x321   : > { %1531 = vadd.xlane.f32.xlu1 %v1530_v38 }
 0x3a2   : > { %v1523_v39 = vpop.xlane.xlu0 %1522 }
 0x3a3   : > { %2751 = vrcp.f32 %v1523_v39 }
 0x3a6   : > { %v1526_v40 = vpop.xlane.xlu1 %1525 }
 0x3a7   : > { %2753 = vrcp.f32 %v1526_v40 }
 0x3aa   : > { %v1529_v41 = vpop.xlane.xlu0 %1528 }
 0x3ab   : > { %2755 = vrcp.f32 %v1529_v41 }
 0x3ad   : > { %v2752_v42 = vpop.eup %2751 }
 0x3ae   : > { %v1537_v43 = vmul.f32 %v2752_v42, %v2744_v30  ;;  %v1532_v44 = vpop.xlane.xlu1 %1531 }
 0x3af   : > { %2757 = vrcp.f32 %v1532_v44  ;;  %v2395_v44 = vld [vmem:[%s3586_s8] ss:$0 sm:$0xff] }
 0x3b0   : > { %v1541_v45 = vpack.c.bf16 %v1537_v43, %v1537_v43 }
 0x3b1   : > { %v2754_v46 = vpop.eup %2753 }
 0x3b2   : > { %v1538_v47 = vmul.f32 %v2754_v46, %v2746_v33  ;;  %2569 = vmatmul.mubr.msk.bf16.vlgmr.msra.gmra.mrb[32].mxu0 %vm1496_vm4, %v1541_v45 }
 0x3b3   : > { %2579 = vmatpush3.bf16.msra.mxu0 %v3404_v52  ;;  %2580 = vmatprep.mubr.msk.bf16.mxu0 %vm2964_vm0, %v2963_v0 }
 0x3b4   : > { %v1542_v48 = vpack.c.bf16 %v1538_v47, %v1538_v47  ;;  %2590 = vmatprep.subr.bf16.mxu0 %v2963_v0 }
 0x3b5   : > { %v2756_v49 = vpop.eup %2755 }
 0x3b6   : > { %v1539_v51 = vmul.f32 %v2756_v49, %v2748_v35  ;;  %2575 = vmatmul.mubr.msk.bf16.vlgmr.msra.gmra.mrb[32].mxu1 %vm1496_vm4, %v1542_v48 }
 0x3b7   : > { %2585 = vmatpush3.bf16.msra.mxu1 %v3407_v56  ;;  %2586 = vmatprep.mubr.msk.bf16.mxu1 %vm2964_vm0, %v2963_v0 }
 0x3b8   : > { %v1543_v52 = vpack.c.bf16 %v1539_v51, %v1539_v51  ;;  %2598 = vmatprep.subr.bf16.mxu1 %v2963_v0 }
 0x3b9   : > { %v2758_v53 = vpop.eup %2757 }
 0x3ba   : > { %v1540_v57 = vmul.f32 %v2758_v53, %v2750_v37  ;;  %2581 = vmatmul.mubr.msk.bf16.vlgmr.msra.gmra.mrb[36].mxu0 %vm1496_vm4, %v1543_v52 }
 0x3bb   : > { %2594 = vmatprep.mubr.msk.bf16.mxu0 %vm2964_vm0, %v2963_v0 }
 0x3bc   : > { %v1544_v56 = vpack.c.bf16 %v1540_v57, %v1540_v57  ;;  %2591 = vmatpush3.bf16.xpose.msra.mxu0 %v1768_v54 }
 0x3bd   : > { %2592 = vmatprep.subr.bf16.mxu0 %v2963_v0 }
 0x3be   : > { %2587 = vmatmul.mubr.msk.bf16.vlgmr.msra.gmra.mrb[36].mxu1 %vm1496_vm4, %v1544_v56  ;;  %v2739_v56 = vld [vmem:[%s3589_s11] sm:$0xff]  }
 0x3bf   : > { %2602 = vmatprep.mubr.msk.bf16.mxu1 %vm2964_vm0, %v2963_v0 }
 0x3c0   : > { %2599 = vmatpush3.bf16.xpose.msra.mxu1 %v1827_v58  ;;  %v2740_v58 = vld [vmem:[%s3589_s11 + $0x8] sm:$0xff]  }
 0x3c1   : > { %2600 = vmatprep.subr.bf16.mxu1 %v2963_v0 }
 0x3c4   : > { %2593 = vmatpush3.bf16.xpose.msra.mxu0 %v1771_v60 }
 0x3c5   : > { %2606 = vmatprep.subr.bf16.mxu0 %v2963_v0 }
 0x3c8   : > { %2601 = vmatpush3.bf16.xpose.msra.mxu1 %v1830_v62 }
 0x3c9   : > { %2614 = vmatprep.subr.bf16.mxu1 %v2963_v0 }
 0x485   : > { %v1590_v1 = vpop.f32.mrb[32].mxu0 }
 0x486   : > { %v1734_v2 = vpack.c.bf16 %v1590_v1, %v1590_v1  ;;  %v2570_v3 = vpop.f32.mrb[33].mxu0 }
 0x487   : > { %v1593_v7 = vpop.f32.mrb[34].mxu0 }
 0x488   : > { %v2571_v8 = vpop.f32.mrb[35].mxu0  ;;  %2595 = vmatmul.mubr.msk.bf16.vlgmr.msra.gmra.mrb[40].mxu0 %vm1307_vm2, %v1734_v2  ;;  %v2397_v7 = vld [vmem:[%s3638_s16] ss:$0 sm:$0xff]  ;;  %s3641_s16 = sld [smem:[#allocation25_spill]] }
 0x489   : > { %2607 = vmatpush3.bf16.xpose.msra.mxu0 %v1886_v5  ;;  %v1636_v9 = vpop.f32.mrb[32].mxu1  ;;  %2610 = vmatprep.mubr.msk.bf16.mxu0 %vm2964_vm0, %v2963_v0  ;;  %v2396_v5 = vld [vmem:[%s3587_s9] ss:$0 sm:$0xff] }
 0x48a   : > { %v1735_v10 = vpack.c.bf16 %v1636_v9, %v1636_v9  ;;  %v2576_v11 = vpop.f32.mrb[33].mxu1  ;;  %2608 = vmatprep.subr.bf16.mxu0 %v2963_v0 }
 0x48b   : > { %v1639_v14 = vpop.f32.mrb[34].mxu1  ;;  %v2741_v11 = vld [vmem:[%s3639_s17] sm:$0xff]  }
 0x48c   : > { %v2577_v15 = vpop.f32.mrb[35].mxu1  ;;  %2603 = vmatmul.mubr.msk.bf16.vlgmr.msra.gmra.mrb[40].mxu1 %vm1307_vm2, %v1735_v10 }
 0x48d   : > { %2615 = vmatpush3.bf16.xpose.msra.mxu1 %v1945_v12  ;;  %v1682_v16 = vpop.f32.mrb[36].mxu0  ;;  %2618 = vmatprep.mubr.msk.bf16.mxu1 %vm2964_vm0, %v2963_v0  ;;  %v2742_v12 = vld [vmem:[%s3639_s17 + $0x8] sm:$0xff]  }
 0x48e   : > { %v2582_v17 = vpop.f32.mrb[37].mxu0  ;;  %2616 = vmatprep.subr.bf16.mxu1 %v2963_v0  ;;  %v1736_v27 = vpack.c.bf16 %v1682_v16, %v1682_v16 }
 0x48f   : > { %v1685_v20 = vpop.f32.mrb[38].mxu0 }
 0x490   : > { %v2583_v21 = vpop.f32.mrb[39].mxu0 }
 0x491   : > { %2609 = vmatpush3.bf16.xpose.msra.mxu0 %v1889_v18  ;;  %v1728_v22 = vpop.f32.mrb[36].mxu1 }
 0x492   : > { %v2588_v23 = vpop.f32.mrb[37].mxu1  ;;  %2622 = vmatprep.subr.bf16.mxu0 %v2963_v0  ;;  %v1737_v28 = vpack.c.bf16 %v1728_v22, %v1728_v22 }
 0x493   : > { %v1731_v25 = vpop.f32.mrb[38].mxu1 }
 0x494   : > { %v2589_v26 = vpop.f32.mrb[39].mxu1 }
 0x495   : > { %2617 = vmatpush3.bf16.xpose.msra.mxu1 %v1948_v24 }
 0x496   : > { %2630 = vmatprep.subr.bf16.mxu1 %v2963_v0 }
 0x498   : > { %2611 = vmatmul.mubr.msk.bf16.vlgmr.msra.gmra.mrb[44].mxu0 %vm1307_vm2, %v1736_v27 }
 0x499   : > { %2626 = vmatprep.mubr.msk.bf16.mxu0 %vm2964_vm0, %v2963_v0  ;;  %2623 = vmatpush3.bf16.msra.mxu0 %v2739_v56 }
 0x49a   : > { %2624 = vmatprep.subr.bf16.mxu0 %v2963_v0 }
 0x49c   : > { %2619 = vmatmul.mubr.msk.bf16.vlgmr.msra.gmra.mrb[44].mxu1 %vm1307_vm2, %v1737_v28 }
 0x49d   : > { %2634 = vmatprep.mubr.msk.bf16.mxu1 %vm2964_vm0, %v2963_v0  ;;  %2625 = vmatpush3.bf16.msra.mxu0 %v2740_v58 }
 0x49e   : > { %2631 = vmatpush3.bf16.msra.mxu1 %v2741_v11 }
 0x49f   : > { %2632 = vmatprep.subr.bf16.mxu1 %v2963_v0  ;;  %v2402_v0 = vld [vmem:[%s3641_s16] ss:$0 sm:$0xff] }
 0x4a2   : > { %2633 = vmatpush3.bf16.msra.mxu1 %v2742_v12 }
 0x55b   : > { %v1807_v29 = vpop.f32.mrb[40].mxu0 }
 0x55c   : > { %v2596_v30 = vpop.f32.mrb[41].mxu0 }
 0x55d   : > { %v1810_v31 = vpop.f32.mrb[42].mxu0 }
 0x55e   : > { %v2597_v32 = vpop.f32.mrb[43].mxu0 }
 0x55f   : > { %v1866_v33 = vpop.f32.mrb[40].mxu1 }
 0x560   : > { %v1990_v34 = vadd.f32 %v1866_v33, %v1807_v29  ;;  %v2604_v35 = vpop.f32.mrb[41].mxu1 }
 0x561   : > { %v1869_v36 = vpop.f32.mrb[42].mxu1 }
 0x562   : > { %v2605_v37 = vpop.f32.mrb[43].mxu1 }
 0x56b   : > { %v1925_v38 = vpop.f32.mrb[44].mxu0 }
 0x56c   : > { %v1991_v39 = vadd.f32 %v1990_v34, %v1925_v38  ;;  %v2612_v40 = vpop.f32.mrb[45].mxu0 }
 0x56d   : > { %v1928_v41 = vpop.f32.mrb[46].mxu0 }
 0x56e   : > { %v2613_v42 = vpop.f32.mrb[47].mxu0 }
 0x56f   : > { %v1984_v43 = vpop.f32.mrb[44].mxu1  ;;  %v2406_v42 = vld [vmem:[%s3642_s24] ss:$0 sm:$0xff]  ;;  %s2887_s24 = scalar_lea.vmem %s2886_s29, 256 }
 0x570   : > { %v1992_v45 = vadd.f32 %v1991_v39, %v1984_v43  ;;  %v2620_v46 = vpop.f32.mrb[45].mxu1  ;;  %p2889_p1 = scmp.lt.s32.totalorder %s2887_s24, %s2881_s19 }
 0x571   : > { %v1987_v47 = vpop.f32.mrb[46].mxu1 }
 0x572   : > { %v2000_v48 = vadd.f32 %v2395_v44, %v1992_v45  ;;  %v2621_v49 = vpop.f32.mrb[47].mxu1  ;;  %v2407_v44 = vld [vmem:[%s3643_s1] ss:$0 sm:$0xff]  ;;  %p2890_p2 = por %p2889_p1, %p2888_p12 }
 0x574   : > { %v2001_v50 = vadd.f32 %v2000_v48, %v3286_v4  ;;  %p2891_p4 = pnand %p2890_p2, %p2884_p7 }
 0x576   : > { %v2004_v51 = vsel %vm652_vm1, %v2001_v50, 0.0 }
 0x577   : > { %2005 = vadd.xlane.f32.xlu0 %v2004_v51 }
 0x604   : > { %v2006_v52 = vpop.xlane.xlu0 %2005 }
 0x605   : > { %v2008_v53 = vmul.f32 0.03125, %v2006_v52 }
 0x607   : > { %v2009_v54 = vsub.f32 %v2001_v50, %v2008_v53 }
 0x609   : > { %v2010_v55 = vmul.f32 %v2009_v54, %v2009_v54 }
 0x60b   : > { %v2011_v57 = vsel %vm652_vm1, %v2010_v55, 0.0 }
 0x60c   : > { %2012 = vadd.xlane.f32.xlu1 %v2011_v57 }
 0x699   : > { %v2013_v4 = vpop.xlane.xlu1 %2012 }
 0x69a   : > { %v2014_v59 = vmul.f32 0.032258064, %v2013_v4 }
 0x69c   : > { %2759 = vrsqrt.f32 %v2014_v59  ;;  %vm2017_vm5 = vcmp.eq.f32.partialorder %v2014_v59, inf  ;;  %v2020_v62 = vand.u32 2147483648, %v2014_v59  ;;  %vm2019_vm6 = vcmp.eq.f32.partialorder %v2014_v59, 0.0 }
 0x6a6   : > { %v2760_v60 = vpop.eup %2759 }
 0x6a7   : > { %v2016_v61 = vmul.f32 %v2760_v60, %v2014_v59 }
 0x6a9   : > { %v2018_v63 = vsel %vm2017_vm5, %v2014_v59, %v2016_v61 }
 0x6aa   : > { %v2021_v1 = vsel %vm2019_vm6, %v2020_v62, %v2018_v63 }
 0x6ab   : > { %v2022_v2 = vadd.f32 0.001, %v2021_v1 }
 0x6ad   : > { %2761 = vrcp.f32 %v2022_v2 }
 0x6b7   : > { %v2762_v3 = vpop.eup %2761 }
 0x6b8   : > { %v2024_v6 = vmul.f32 %v2762_v3, %v2009_v54 }
 0x6ba   : > { %v2031_v8 = vmul.f32 %v2396_v5, %v2024_v6 }
 0x6bc   : > { %v2038_v9 = vadd.f32 %v2397_v7, %v2031_v8 }
 0x6be   : > { %v2039_v10 = vpack.c.bf16 %v2038_v9, %v2038_v9 }
 0x6c0   : > { %2627 = vmatmul.mubr.msk.bf16.vlgmr.msra.gmra.mrb[48].mxu0 %vm652_vm1, %v2039_v10 }
 0x793   : > { %v2100_v14 = vpop.f32.mrb[48].mxu0 }
 0x794   : > { %v2101_v15 = vadd.f32 %v2398_v13, %v2100_v14  ;;  %v2628_v16 = vpop.f32.mrb[49].mxu0 }
 0x795   : > { %v2103_v17 = vpop.f32.mrb[50].mxu0 }
 0x796   : > { %v2106_v18 = vmax.f32 %v2101_v15, 0.0  ;;  %v2629_v19 = vpop.f32.mrb[51].mxu0 }
 0x798   : > { %v2107_v20 = vpack.c.bf16 %v2106_v18, %v2106_v18 }
 0x79a   : > { %2635 = vmatmul.mubr.msk.bf16.vlgmr.msra.gmra.mrb[48].mxu1 %vm652_vm1, %v2107_v20 }
 0x86d   : > { %v2168_v21 = vpop.f32.mrb[48].mxu1 }
 0x86e   : > { %v2169_v22 = vadd.f32 %v2402_v0, %v2168_v21  ;;  %v2636_v23 = vpop.f32.mrb[49].mxu1 }
 0x86f   : > { %v2171_v24 = vpop.f32.mrb[50].mxu1 }
 0x870   : > { %v2637_v25 = vpop.f32.mrb[51].mxu1  ;;  %v2174_v26 = vadd.f32 %v2169_v22, %v2038_v9 }
 0x872   : > { %v2177_v27 = vsel %vm652_vm1, %v2174_v26, 0.0 }
 0x873   : > { %2178 = vadd.xlane.f32.xlu0 %v2177_v27 }
 0x900   : > { %v2179_v28 = vpop.xlane.xlu0 %2178 }
 0x901   : > { %v2180_v29 = vmul.f32 0.03125, %v2179_v28 }
 0x903   : > { %v2181_v30 = vsub.f32 %v2174_v26, %v2180_v29 }
 0x905   : > { %v2182_v31 = vmul.f32 %v2181_v30, %v2181_v30 }
 0x907   : > { %v2183_v32 = vsel %vm652_vm1, %v2182_v31, 0.0 }
 0x908   : > { %2184 = vadd.xlane.f32.xlu1 %v2183_v32 }
 0x995   : > { %v2185_v33 = vpop.xlane.xlu1 %2184 }
 0x996   : > { %v2186_v34 = vmul.f32 0.032258064, %v2185_v33 }
 0x998   : > { %2763 = vrsqrt.f32 %v2186_v34  ;;  %vm2189_vm7 = vcmp.eq.f32.partialorder %v2186_v34, inf  ;;  %v2192_v37 = vand.u32 2147483648, %v2186_v34  ;;  %vm2191_vm8 = vcmp.eq.f32.partialorder %v2186_v34, 0.0 }
 0x9a2   : > { %v2764_v35 = vpop.eup %2763 }
 0x9a3   : > { %v2188_v36 = vmul.f32 %v2764_v35, %v2186_v34 }
 0x9a5   : > { %v2190_v38 = vsel %vm2189_vm7, %v2186_v34, %v2188_v36 }
 0x9a6   : > { %v2193_v39 = vsel %vm2191_vm8, %v2192_v37, %v2190_v38 }
 0x9a7   : > { %v2194_v40 = vadd.f32 0.001, %v2193_v39 }
 0x9a9   : > { %2765 = vrcp.f32 %v2194_v40 }
 0x9b3   : > { %v2766_v41 = vpop.eup %2765 }
 0x9b4   : > { %v2196_v43 = vmul.f32 %v2766_v41, %v2181_v30 }
 0x9b6   : > { %v2203_v45 = vmul.f32 %v2406_v42, %v2196_v43 }
 0x9b8   : > { %v2210_v46 = vadd.f32 %v2407_v44, %v2203_v45 }
 0x9ba   : > { %2211 = vst.msk [vmem:[%s607_s10] sm:$0xff] %vm652_vm1, %v2210_v46 }
 0x9bb   : > { %2894 = shalt.err (!%p2891_p4)
}
 0x9bc   : > { %s2895_s2 = scalar_lea.hbm %s3533_s4, 128  ;;  %s2899_s18 = scalar_lea.hbm %s3644_s3, 256 }
 0x9bd   : > { %p2896_p0 = scmp.ne.s32.totalorder %s3533_s4, %s2895_s2  ;;  %p2900_p8 = scmp.lt.u32.totalorder %s3533_s4, %s3644_s3 }
 0x9be   : > { %p2901_p13 = scmp.lt.u32.totalorder %s2899_s18, %s2895_s2  ;;  %p2903_p10 = scmp.lt.u32.totalorder %s2895_s2, %s3533_s4 }
 0x9bf   : > { %p2897_p9 = pnand %p2896_p0, %p3210_p5 }
 0x9c0   : > { %p2902_p6 = por %p2901_p13, %p2900_p8 }
 0x9c1   : > { %p2898_p11 = pneg %p2897_p9 }
 0x9c2   : > { %p2904_p3 = por %p2903_p10, %p2902_p6 }
 0x9c4   : > { %p2905_p7 = pnand %p2904_p3, %p2898_p11 }
 0x9c6   : > { %2908 = shalt.err (!%p2905_p7)
}
 0x9c7   : > { %2652 = dma.vmem_to_hbm [thread:$0]  (%p3210_p5), %s3535_s30, 128, %s3533_s4, %s2213_s12  }
 0x9c8 PF: > { %s3645_s10 = sld [smem:[#allocation15_spill]]  ;;  %s3646_s16 = sld [smem:[#allocation16_spill]] }
 0x9c9   : > { %p3648_p1 = scmp.ge.s32.totalorder %s2955_s27, 2 }
 0x9ce   : > { %s2238_s19 = sand.u32 1, %s3645_s10   ;;  %p3647_p12 = scmp.ne.s32.totalorder %s3646_s16, 0 }
 0x9cf   : > { %s2239_s28 = scalar_lea.sflag [#allocation4], %s2238_s19 }
 0x9d0   : > { %p2669_p2 = pnand %p3648_p1, %p3647_p12 }
 0x9d2   : > { %2938 = dma.done.wait (!%p2669_p2), %s2239_s28, 128  }
 0x9d3   : > { %2940 = vsyncadd (!%p2669_p2), %s2239_s28, 4294967168  ;;  %p32_p4 = scmp.ge.s32.totalorder %s3196_s15, 4   ;;  %s3649_s24 = smov %s2947_s25 }
 0x9d4   : > { %s3650_s25 = smov %s2951_s26  ;;  %s3651_s26 = smov %s3206_s13 }
 0x9d5   : > { %s3652_s27 = smov %s3196_s15  ;;  %34 = sbr.rel (!%p32_p4) target bundleno = 20 (0x14), region = 145 }
 0x9dc   :  { %2244 = vsyncpa [#allocation3], 1 }
 0x9dd   :  { %2246 = vsyncpa [#allocation3 + $0x1], 1 }
 0x9de   :  { %2247 = vsyncpa [#allocation6], 1 }
 0x9df   :  { %2248 = vsyncpa [#allocation9], 1 }
 0x9e0   :  { %2249 = vsyncpa [#allocation4], 1 }
 0x9e1   :  { %2251 = vsyncpa [#allocation4 + $0x1], 1 }

</bundles_post_ra>
